<compile_context>
chip_gen: v7x
topology: tpu7x:2x2x1
jax: 0.10.0
libtpu: 0.0.40
codegen_flags: <defaults>
</compile_context>

<pallas_src>
import functools

import jax
import jax.numpy as jnp
from jax import lax
from jax.experimental import pallas as pl
from jax.experimental.pallas import tpu as pltpu


def attention_kernel(x_ref, wq_ref, wk_ref, wv_ref, wp_ref, b_ref, out_ref, *, num_heads):
    """One batch per grid step; all heads handled in-kernel.

    x_ref  : (1, N, C)  per-batch activations (f32, cast to bf16 once)
    wq_ref : (H, C, D)  bf16, attention scale pre-folded
    wk_ref : (H, C, D)  bf16
    wv_ref : (H, C, D)  bf16
    wp_ref : (H, D, C)  bf16 per-head rows of W_proj^T
    b_ref  : (1, C)     f32 proj bias
    out_ref: (1, N, C)
    """
    x = x_ref[0].astype(jnp.bfloat16)                       # (N, C) cast once for the MXU
    n = x.shape[0]
    c = out_ref.shape[-1]

    acc = jnp.zeros((n, c), jnp.float32)                    # f32 head-sum accumulator
    for h in range(num_heads):                              # static unroll; weights resident
        # Per-head projections: bf16 MXU, f32 results. Scale already folded into wq.
        q = jnp.dot(x, wq_ref[h], preferred_element_type=jnp.float32)     # (N, D)
        k = jnp.dot(x, wk_ref[h], preferred_element_type=jnp.float32)     # (N, D)
        v = jnp.dot(x, wv_ref[h], preferred_element_type=jnp.float32)     # (N, D)

        # scores = q @ k^T (contract head dim in place, no transpose materialized)
        s = lax.dot_general(q.astype(jnp.bfloat16), k.astype(jnp.bfloat16),
                            (((1,), (1,)), ((), ())),
                            preferred_element_type=jnp.float32)            # (N, N) f32

        # Safe softmax numerator/denominator in f32; normalization deferred past P@V.
        m = jnp.max(s, axis=-1, keepdims=True)
        e = jnp.exp(s - m)
        l = jnp.sum(e, axis=-1, keepdims=True)

        o = jnp.dot(e.astype(jnp.bfloat16), v.astype(jnp.bfloat16),
                    preferred_element_type=jnp.float32)                    # (N, D) un-normalized
        o = o * pl.reciprocal(l, approx=True)                              # EUP recip, N*D mults

        # Per-head slice of the output projection, accumulated in f32.
        acc = acc + jnp.dot(o.astype(jnp.bfloat16), wp_ref[h],
                            preferred_element_type=jnp.float32)            # (N, C)

    out_ref[0] = (acc + b_ref[...]).astype(out_ref.dtype)   # bias folded into the final write


def attention(x, params, num_heads):
    B, N, C = x.shape
    D = C // num_heads
    scale = D ** -0.5

    # Host-side one-time repack into lane-aligned bf16 per-head slabs.
    # W_qkv^T is (C, 3C) with output columns ordered [3, H, D].
    w = params["w_qkv_t"].reshape(C, 3, num_heads, D)
    wq = (w[:, 0].transpose(1, 0, 2) * scale).astype(jnp.bfloat16)         # (H, C, D), scale folded
    wk = w[:, 1].transpose(1, 0, 2).astype(jnp.bfloat16)                   # (H, C, D)
    wv = w[:, 2].transpose(1, 0, 2).astype(jnp.bfloat16)                   # (H, C, D)
    # W_proj^T is (C, C) with input rows indexed by (head, d).
    wp = params["w_proj_t"].reshape(num_heads, D, C).astype(jnp.bfloat16)  # (H, D, C)
    bp = params["b_proj"].reshape(1, C).astype(jnp.float32)

    cost = pl.CostEstimate(
        flops=(2 * B * N * C * 3 * C               # q/k/v projections
               + 4 * B * num_heads * N * N * D     # q@k^T and e@v
               + 2 * B * N * C * C),               # output projection
        transcendentals=B * num_heads * N * N,     # softmax exp
        bytes_accessed=(4 * 2 * B * N * C          # x in + out (f32)
                        + 2 * 4 * C * C            # bf16 qkv + proj weights (fetched once)
                        + 4 * C),                  # bias
    )

    kernel = functools.partial(attention_kernel, num_heads=num_heads)

    def wspec(shape):
        return pl.BlockSpec(shape, lambda b: (0, 0, 0))     # constant block index -> resident

    return pl.pallas_call(
        kernel,
        out_shape=jax.ShapeDtypeStruct((B, N, C), x.dtype),
        grid=(B,),
        in_specs=[
            pl.BlockSpec((1, N, C), lambda b: (b, 0, 0)),    # x
            wspec((num_heads, C, D)),                        # wq (scale folded)
            wspec((num_heads, C, D)),                        # wk
            wspec((num_heads, C, D)),                        # wv
            wspec((num_heads, D, C)),                        # wproj
            pl.BlockSpec((1, C), lambda b: (0, 0)),          # proj bias
        ],
        out_specs=pl.BlockSpec((1, N, C), lambda b: (b, 0, 0)),
        compiler_params=pltpu.CompilerParams(dimension_semantics=("parallel",)),
        cost_estimate=cost,
    )(x, wq, wk, wv, wp, bp)


def attention_ref(x, params, num_heads):
    """Plain-JAX f32 reference mirroring the PyTorch forward (defaults, eval mode)."""
    B, N, C = x.shape
    D = C // num_heads
    scale = D ** -0.5
    qkv = jnp.einsum("bnc,cd->bnd", x, params["w_qkv_t"])                 # (B, N, 3C)
    qkv = qkv.reshape(B, N, 3, num_heads, D).transpose(2, 0, 3, 1, 4)     # (3, B, H, N, D)
    q, k, v = qkv[0], qkv[1], qkv[2]
    attn = jnp.einsum("bhnd,bhmd->bhnm", q, k) * scale
    attn = jax.nn.softmax(attn, axis=-1)
    o = jnp.einsum("bhnm,bhmd->bhnd", attn, v)
    o = o.transpose(0, 2, 1, 3).reshape(B, N, C)
    return jnp.einsum("bnc,cd->bnd", o, params["w_proj_t"]) + params["b_proj"]


def init_params(key, dim):
    ks = jax.random.split(key, 3)
    f32 = jnp.float32
    return {
        # weights stored pre-transposed as (in_features, out_features)
        "w_qkv_t":  0.1 * jax.random.normal(ks[0], (dim, 3 * dim), f32),
        "w_proj_t": 0.1 * jax.random.normal(ks[1], (dim, dim), f32),
        "b_proj":   0.05 * jax.random.normal(ks[2], (dim,), f32),
    }


if __name__ == "__main__":
    B, N, dim, num_heads = 2, 16, 64, 8   # head_dim = 8

    key = jax.random.PRNGKey(0)
    kx, kp = jax.random.split(key)
    x = jax.random.normal(kx, (B, N, dim), jnp.float32)
    params = init_params(kp, dim)

    out = jax.block_until_ready(attention(x, params, num_heads))
    ref = jax.block_until_ready(attention_ref(x, params, num_heads))

    assert out.shape == (B, N, dim)
    # Kernel runs bf16 MXU math + approx reciprocal vs the exact-f32 reference,
    # so the tolerance is bf16-level.
    assert jnp.allclose(out, ref, atol=1e-1, rtol=1e-1), "mismatch vs reference"
    print("KERNEL_OK")
</pallas_src>

<mosaic_0001>
module attributes {stable_mosaic.version = 11 : i64} {
  func.func @attention_kernel(%arg0: i32, %arg1: memref<1x16x64xf32, #tpu.memory_space<vmem>>, %arg2: memref<8x64x8xbf16, #tpu.memory_space<vmem>>, %arg3: memref<8x64x8xbf16, #tpu.memory_space<vmem>>, %arg4: memref<8x64x8xbf16, #tpu.memory_space<vmem>>, %arg5: memref<8x8x64xbf16, #tpu.memory_space<vmem>>, %arg6: memref<1x64xf32, #tpu.memory_space<vmem>>, %arg7: memref<1x16x64xf32, #tpu.memory_space<vmem>>) attributes {dimension_semantics = [#tpu.dimension_semantics<parallel>], iteration_bounds = array<i64: 2>, scalar_prefetch = 0 : i64, scratch_operands = 0 : i64, tpu.core_type = #tpu.core_type<tc>, window_params = [{transform_indices = @transform_0, window_bounds = array<i64: 1, 16, 64>}, {pipeline_mode = #tpu.pipeline_mode<synchronous>, transform_indices = @transform_1, window_bounds = array<i64: 8, 64, 8>}, {pipeline_mode = #tpu.pipeline_mode<synchronous>, transform_indices = @transform_2, window_bounds = array<i64: 8, 64, 8>}, {pipeline_mode = #tpu.pipeline_mode<synchronous>, transform_indices = @transform_3, window_bounds = array<i64: 8, 64, 8>}, {pipeline_mode = #tpu.pipeline_mode<synchronous>, transform_indices = @transform_4, window_bounds = array<i64: 8, 8, 64>}, {pipeline_mode = #tpu.pipeline_mode<synchronous>, transform_indices = @transform_5, window_bounds = array<i64: 1, 64>}, {transform_indices = @transform_6, window_bounds = array<i64: 1, 16, 64>}]} {
    %c0 = arith.constant 0 : index
    %c0_0 = arith.constant 0 : index
    %c0_1 = arith.constant 0 : index
    %0 = vector.load %arg1[%c0, %c0_0, %c0_1] : memref<1x16x64xf32, #tpu.memory_space<vmem>>, vector<1x16x64xf32>
    %1 = vector.shape_cast %0 : vector<1x16x64xf32> to vector<16x64xf32>
    %2 = arith.truncf %1 : vector<16x64xf32> to vector<16x64xbf16>
    %cst = arith.constant 0.000000e+00 : f32
    %3 = vector.broadcast %cst : f32 to vector<16x64xf32>
    %c0_2 = arith.constant 0 : index
    %c0_3 = arith.constant 0 : index
    %c0_4 = arith.constant 0 : index
    %4 = vector.load %arg2[%c0_2, %c0_3, %c0_4] : memref<8x64x8xbf16, #tpu.memory_space<vmem>>, vector<1x64x8xbf16>
    %5 = vector.shape_cast %4 : vector<1x64x8xbf16> to vector<64x8xbf16>
    %cst_5 = arith.constant dense<0.000000e+00> : vector<16x8xf32>
    %6 = tpu.matmul %2, %5, %cst_5 {dimension_numbers = #tpu.dot_dimension_numbers<[1], [0], [0], [1], [0, 0, 1, 1], [], []>} : vector<16x64xbf16>, vector<64x8xbf16>, vector<16x8xf32> -> vector<16x8xf32>
    %c0_6 = arith.constant 0 : index
    %c0_7 = arith.constant 0 : index
    %c0_8 = arith.constant 0 : index
    %7 = vector.load %arg3[%c0_6, %c0_7, %c0_8] : memref<8x64x8xbf16, #tpu.memory_space<vmem>>, vector<1x64x8xbf16>
    %8 = vector.shape_cast %7 : vector<1x64x8xbf16> to vector<64x8xbf16>
    %cst_9 = arith.constant dense<0.000000e+00> : vector<16x8xf32>
    %9 = tpu.matmul %2, %8, %cst_9 {dimension_numbers = #tpu.dot_dimension_numbers<[1], [0], [0], [1], [0, 0, 1, 1], [], []>} : vector<16x64xbf16>, vector<64x8xbf16>, vector<16x8xf32> -> vector<16x8xf32>
    %c0_10 = arith.constant 0 : index
    %c0_11 = arith.constant 0 : index
    %c0_12 = arith.constant 0 : index
    %10 = vector.load %arg4[%c0_10, %c0_11, %c0_12] : memref<8x64x8xbf16, #tpu.memory_space<vmem>>, vector<1x64x8xbf16>
    %11 = vector.shape_cast %10 : vector<1x64x8xbf16> to vector<64x8xbf16>
    %cst_13 = arith.constant dense<0.000000e+00> : vector<16x8xf32>
    %12 = tpu.matmul %2, %11, %cst_13 {dimension_numbers = #tpu.dot_dimension_numbers<[1], [0], [0], [1], [0, 0, 1, 1], [], []>} : vector<16x64xbf16>, vector<64x8xbf16>, vector<16x8xf32> -> vector<16x8xf32>
    %13 = arith.truncf %6 : vector<16x8xf32> to vector<16x8xbf16>
    %14 = arith.truncf %9 : vector<16x8xf32> to vector<16x8xbf16>
    %cst_14 = arith.constant dense<0.000000e+00> : vector<16x16xf32>
    %15 = tpu.matmul %13, %14, %cst_14 {dimension_numbers = #tpu.dot_dimension_numbers<[1], [1], [0], [0], [0, 0, 1, 0], [], []>} : vector<16x8xbf16>, vector<16x8xbf16>, vector<16x16xf32> -> vector<16x16xf32>
    %cst_15 = arith.constant dense<0xFF800000> : vector<16xf32>
    %16 = vector.multi_reduction <maximumf>, %15, %cst_15 [1] : vector<16x16xf32> to vector<16xf32>
    %17 = vector.shape_cast %16 : vector<16xf32> to vector<16x1xf32>
    %18 = vector.broadcast %17 : vector<16x1xf32> to vector<16x16xf32>
    %19 = arith.subf %15, %18 : vector<16x16xf32>
    %20 = math.exp %19 : vector<16x16xf32>
    %cst_16 = arith.constant dense<0.000000e+00> : vector<16xf32>
    %21 = vector.multi_reduction <add>, %20, %cst_16 [1] : vector<16x16xf32> to vector<16xf32>
    %22 = vector.shape_cast %21 : vector<16xf32> to vector<16x1xf32>
    %23 = arith.truncf %20 : vector<16x16xf32> to vector<16x16xbf16>
    %24 = arith.truncf %12 : vector<16x8xf32> to vector<16x8xbf16>
    %cst_17 = arith.constant dense<0.000000e+00> : vector<16x8xf32>
    %25 = tpu.matmul %23, %24, %cst_17 {dimension_numbers = #tpu.dot_dimension_numbers<[1], [0], [0], [1], [0, 0, 1, 1], [], []>} : vector<16x16xbf16>, vector<16x8xbf16>, vector<16x8xf32> -> vector<16x8xf32>
    %26 = tpu.reciprocal %22 {approx = true} : vector<16x1xf32> -> vector<16x1xf32>
    %27 = vector.broadcast %26 : vector<16x1xf32> to vector<16x8xf32>
    %28 = arith.mulf %25, %27 : vector<16x8xf32>
    %29 = arith.truncf %28 : vector<16x8xf32> to vector<16x8xbf16>
    %c0_18 = arith.constant 0 : index
    %c0_19 = arith.constant 0 : index
    %c0_20 = arith.constant 0 : index
    %30 = vector.load %arg5[%c0_18, %c0_19, %c0_20] : memref<8x8x64xbf16, #tpu.memory_space<vmem>>, vector<1x8x64xbf16>
    %31 = vector.shape_cast %30 : vector<1x8x64xbf16> to vector<8x64xbf16>
    %cst_21 = arith.constant dense<0.000000e+00> : vector<16x64xf32>
    %32 = tpu.matmul %29, %31, %cst_21 {dimension_numbers = #tpu.dot_dimension_numbers<[1], [0], [0], [1], [0, 0, 1, 1], [], []>} : vector<16x8xbf16>, vector<8x64xbf16>, vector<16x64xf32> -> vector<16x64xf32>
    %33 = arith.addf %3, %32 : vector<16x64xf32>
    %c1 = arith.constant 1 : index
    %c0_22 = arith.constant 0 : index
    %c0_23 = arith.constant 0 : index
    %34 = vector.load %arg2[%c1, %c0_22, %c0_23] : memref<8x64x8xbf16, #tpu.memory_space<vmem>>, vector<1x64x8xbf16>
    %35 = vector.shape_cast %34 : vector<1x64x8xbf16> to vector<64x8xbf16>
    %cst_24 = arith.constant dense<0.000000e+00> : vector<16x8xf32>
    %36 = tpu.matmul %2, %35, %cst_24 {dimension_numbers = #tpu.dot_dimension_numbers<[1], [0], [0], [1], [0, 0, 1, 1], [], []>} : vector<16x64xbf16>, vector<64x8xbf16>, vector<16x8xf32> -> vector<16x8xf32>
    %c1_25 = arith.constant 1 : index
    %c0_26 = arith.constant 0 : index
    %c0_27 = arith.constant 0 : index
    %37 = vector.load %arg3[%c1_25, %c0_26, %c0_27] : memref<8x64x8xbf16, #tpu.memory_space<vmem>>, vector<1x64x8xbf16>
    %38 = vector.shape_cast %37 : vector<1x64x8xbf16> to vector<64x8xbf16>
    %cst_28 = arith.constant dense<0.000000e+00> : vector<16x8xf32>
    %39 = tpu.matmul %2, %38, %cst_28 {dimension_numbers = #tpu.dot_dimension_numbers<[1], [0], [0], [1], [0, 0, 1, 1], [], []>} : vector<16x64xbf16>, vector<64x8xbf16>, vector<16x8xf32> -> vector<16x8xf32>
    %c1_29 = arith.constant 1 : index
    %c0_30 = arith.constant 0 : index
    %c0_31 = arith.constant 0 : index
    %40 = vector.load %arg4[%c1_29, %c0_30, %c0_31] : memref<8x64x8xbf16, #tpu.memory_space<vmem>>, vector<1x64x8xbf16>
    %41 = vector.shape_cast %40 : vector<1x64x8xbf16> to vector<64x8xbf16>
    %cst_32 = arith.constant dense<0.000000e+00> : vector<16x8xf32>
    %42 = tpu.matmul %2, %41, %cst_32 {dimension_numbers = #tpu.dot_dimension_numbers<[1], [0], [0], [1], [0, 0, 1, 1], [], []>} : vector<16x64xbf16>, vector<64x8xbf16>, vector<16x8xf32> -> vector<16x8xf32>
    %43 = arith.truncf %36 : vector<16x8xf32> to vector<16x8xbf16>
    %44 = arith.truncf %39 : vector<16x8xf32> to vector<16x8xbf16>
    %cst_33 = arith.constant dense<0.000000e+00> : vector<16x16xf32>
    %45 = tpu.matmul %43, %44, %cst_33 {dimension_numbers = #tpu.dot_dimension_numbers<[1], [1], [0], [0], [0, 0, 1, 0], [], []>} : vector<16x8xbf16>, vector<16x8xbf16>, vector<16x16xf32> -> vector<16x16xf32>
    %cst_34 = arith.constant dense<0xFF800000> : vector<16xf32>
    %46 = vector.multi_reduction <maximumf>, %45, %cst_34 [1] : vector<16x16xf32> to vector<16xf32>
    %47 = vector.shape_cast %46 : vector<16xf32> to vector<16x1xf32>
    %48 = vector.broadcast %47 : vector<16x1xf32> to vector<16x16xf32>
    %49 = arith.subf %45, %48 : vector<16x16xf32>
    %50 = math.exp %49 : vector<16x16xf32>
    %cst_35 = arith.constant dense<0.000000e+00> : vector<16xf32>
    %51 = vector.multi_reduction <add>, %50, %cst_35 [1] : vector<16x16xf32> to vector<16xf32>
    %52 = vector.shape_cast %51 : vector<16xf32> to vector<16x1xf32>
    %53 = arith.truncf %50 : vector<16x16xf32> to vector<16x16xbf16>
    %54 = arith.truncf %42 : vector<16x8xf32> to vector<16x8xbf16>
    %cst_36 = arith.constant dense<0.000000e+00> : vector<16x8xf32>
    %55 = tpu.matmul %53, %54, %cst_36 {dimension_numbers = #tpu.dot_dimension_numbers<[1], [0], [0], [1], [0, 0, 1, 1], [], []>} : vector<16x16xbf16>, vector<16x8xbf16>, vector<16x8xf32> -> vector<16x8xf32>
    %56 = tpu.reciprocal %52 {approx = true} : vector<16x1xf32> -> vector<16x1xf32>
    %57 = vector.broadcast %56 : vector<16x1xf32> to vector<16x8xf32>
    %58 = arith.mulf %55, %57 : vector<16x8xf32>
    %59 = arith.truncf %58 : vector<16x8xf32> to vector<16x8xbf16>
    %c1_37 = arith.constant 1 : index
    %c0_38 = arith.constant 0 : index
    %c0_39 = arith.constant 0 : index
    %60 = vector.load %arg5[%c1_37, %c0_38, %c0_39] : memref<8x8x64xbf16, #tpu.memory_space<vmem>>, vector<1x8x64xbf16>
    %61 = vector.shape_cast %60 : vector<1x8x64xbf16> to vector<8x64xbf16>
    %cst_40 = arith.constant dense<0.000000e+00> : vector<16x64xf32>
    %62 = tpu.matmul %59, %61, %cst_40 {dimension_numbers = #tpu.dot_dimension_numbers<[1], [0], [0], [1], [0, 0, 1, 1], [], []>} : vector<16x8xbf16>, vector<8x64xbf16>, vector<16x64xf32> -> vector<16x64xf32>
    %63 = arith.addf %33, %62 : vector<16x64xf32>
    %c2 = arith.constant 2 : index
    %c0_41 = arith.constant 0 : index
    %c0_42 = arith.constant 0 : index
    %64 = vector.load %arg2[%c2, %c0_41, %c0_42] : memref<8x64x8xbf16, #tpu.memory_space<vmem>>, vector<1x64x8xbf16>
    %65 = vector.shape_cast %64 : vector<1x64x8xbf16> to vector<64x8xbf16>
    %cst_43 = arith.constant dense<0.000000e+00> : vector<16x8xf32>
    %66 = tpu.matmul %2, %65, %cst_43 {dimension_numbers = #tpu.dot_dimension_numbers<[1], [0], [0], [1], [0, 0, 1, 1], [], []>} : vector<16x64xbf16>, vector<64x8xbf16>, vector<16x8xf32> -> vector<16x8xf32>
    %c2_44 = arith.constant 2 : index
    %c0_45 = arith.constant 0 : index
    %c0_46 = arith.constant 0 : index
    %67 = vector.load %arg3[%c2_44, %c0_45, %c0_46] : memref<8x64x8xbf16, #tpu.memory_space<vmem>>, vector<1x64x8xbf16>
    %68 = vector.shape_cast %67 : vector<1x64x8xbf16> to vector<64x8xbf16>
    %cst_47 = arith.constant dense<0.000000e+00> : vector<16x8xf32>
    %69 = tpu.matmul %2, %68, %cst_47 {dimension_numbers = #tpu.dot_dimension_numbers<[1], [0], [0], [1], [0, 0, 1, 1], [], []>} : vector<16x64xbf16>, vector<64x8xbf16>, vector<16x8xf32> -> vector<16x8xf32>
    %c2_48 = arith.constant 2 : index
    %c0_49 = arith.constant 0 : index
    %c0_50 = arith.constant 0 : index
    %70 = vector.load %arg4[%c2_48, %c0_49, %c0_50] : memref<8x64x8xbf16, #tpu.memory_space<vmem>>, vector<1x64x8xbf16>
    %71 = vector.shape_cast %70 : vector<1x64x8xbf16> to vector<64x8xbf16>
    %cst_51 = arith.constant dense<0.000000e+00> : vector<16x8xf32>
    %72 = tpu.matmul %2, %71, %cst_51 {dimension_numbers = #tpu.dot_dimension_numbers<[1], [0], [0], [1], [0, 0, 1, 1], [], []>} : vector<16x64xbf16>, vector<64x8xbf16>, vector<16x8xf32> -> vector<16x8xf32>
    %73 = arith.truncf %66 : vector<16x8xf32> to vector<16x8xbf16>
    %74 = arith.truncf %69 : vector<16x8xf32> to vector<16x8xbf16>
    %cst_52 = arith.constant dense<0.000000e+00> : vector<16x16xf32>
    %75 = tpu.matmul %73, %74, %cst_52 {dimension_numbers = #tpu.dot_dimension_numbers<[1], [1], [0], [0], [0, 0, 1, 0], [], []>} : vector<16x8xbf16>, vector<16x8xbf16>, vector<16x16xf32> -> vector<16x16xf32>
    %cst_53 = arith.constant dense<0xFF800000> : vector<16xf32>
    %76 = vector.multi_reduction <maximumf>, %75, %cst_53 [1] : vector<16x16xf32> to vector<16xf32>
    %77 = vector.shape_cast %76 : vector<16xf32> to vector<16x1xf32>
    %78 = vector.broadcast %77 : vector<16x1xf32> to vector<16x16xf32>
    %79 = arith.subf %75, %78 : vector<16x16xf32>
    %80 = math.exp %79 : vector<16x16xf32>
    %cst_54 = arith.constant dense<0.000000e+00> : vector<16xf32>
    %81 = vector.multi_reduction <add>, %80, %cst_54 [1] : vector<16x16xf32> to vector<16xf32>
    %82 = vector.shape_cast %81 : vector<16xf32> to vector<16x1xf32>
    %83 = arith.truncf %80 : vector<16x16xf32> to vector<16x16xbf16>
    %84 = arith.truncf %72 : vector<16x8xf32> to vector<16x8xbf16>
    %cst_55 = arith.constant dense<0.000000e+00> : vector<16x8xf32>
    %85 = tpu.matmul %83, %84, %cst_55 {dimension_numbers = #tpu.dot_dimension_numbers<[1], [0], [0], [1], [0, 0, 1, 1], [], []>} : vector<16x16xbf16>, vector<16x8xbf16>, vector<16x8xf32> -> vector<16x8xf32>
    %86 = tpu.reciprocal %82 {approx = true} : vector<16x1xf32> -> vector<16x1xf32>
    %87 = vector.broadcast %86 : vector<16x1xf32> to vector<16x8xf32>
    %88 = arith.mulf %85, %87 : vector<16x8xf32>
    %89 = arith.truncf %88 : vector<16x8xf32> to vector<16x8xbf16>
    %c2_56 = arith.constant 2 : index
    %c0_57 = arith.constant 0 : index
    %c0_58 = arith.constant 0 : index
    %90 = vector.load %arg5[%c2_56, %c0_57, %c0_58] : memref<8x8x64xbf16, #tpu.memory_space<vmem>>, vector<1x8x64xbf16>
    %91 = vector.shape_cast %90 : vector<1x8x64xbf16> to vector<8x64xbf16>
    %cst_59 = arith.constant dense<0.000000e+00> : vector<16x64xf32>
    %92 = tpu.matmul %89, %91, %cst_59 {dimension_numbers = #tpu.dot_dimension_numbers<[1], [0], [0], [1], [0, 0, 1, 1], [], []>} : vector<16x8xbf16>, vector<8x64xbf16>, vector<16x64xf32> -> vector<16x64xf32>
    %93 = arith.addf %63, %92 : vector<16x64xf32>
    %c3 = arith.constant 3 : index
    %c0_60 = arith.constant 0 : index
    %c0_61 = arith.constant 0 : index
    %94 = vector.load %arg2[%c3, %c0_60, %c0_61] : memref<8x64x8xbf16, #tpu.memory_space<vmem>>, vector<1x64x8xbf16>
    %95 = vector.shape_cast %94 : vector<1x64x8xbf16> to vector<64x8xbf16>
    %cst_62 = arith.constant dense<0.000000e+00> : vector<16x8xf32>
    %96 = tpu.matmul %2, %95, %cst_62 {dimension_numbers = #tpu.dot_dimension_numbers<[1], [0], [0], [1], [0, 0, 1, 1], [], []>} : vector<16x64xbf16>, vector<64x8xbf16>, vector<16x8xf32> -> vector<16x8xf32>
    %c3_63 = arith.constant 3 : index
    %c0_64 = arith.constant 0 : index
    %c0_65 = arith.constant 0 : index
    %97 = vector.load %arg3[%c3_63, %c0_64, %c0_65] : memref<8x64x8xbf16, #tpu.memory_space<vmem>>, vector<1x64x8xbf16>
    %98 = vector.shape_cast %97 : vector<1x64x8xbf16> to vector<64x8xbf16>
    %cst_66 = arith.constant dense<0.000000e+00> : vector<16x8xf32>
    %99 = tpu.matmul %2, %98, %cst_66 {dimension_numbers = #tpu.dot_dimension_numbers<[1], [0], [0], [1], [0, 0, 1, 1], [], []>} : vector<16x64xbf16>, vector<64x8xbf16>, vector<16x8xf32> -> vector<16x8xf32>
    %c3_67 = arith.constant 3 : index
    %c0_68 = arith.constant 0 : index
    %c0_69 = arith.constant 0 : index
    %100 = vector.load %arg4[%c3_67, %c0_68, %c0_69] : memref<8x64x8xbf16, #tpu.memory_space<vmem>>, vector<1x64x8xbf16>
    %101 = vector.shape_cast %100 : vector<1x64x8xbf16> to vector<64x8xbf16>
    %cst_70 = arith.constant dense<0.000000e+00> : vector<16x8xf32>
    %102 = tpu.matmul %2, %101, %cst_70 {dimension_numbers = #tpu.dot_dimension_numbers<[1], [0], [0], [1], [0, 0, 1, 1], [], []>} : vector<16x64xbf16>, vector<64x8xbf16>, vector<16x8xf32> -> vector<16x8xf32>
    %103 = arith.truncf %96 : vector<16x8xf32> to vector<16x8xbf16>
    %104 = arith.truncf %99 : vector<16x8xf32> to vector<16x8xbf16>
    %cst_71 = arith.constant dense<0.000000e+00> : vector<16x16xf32>
    %105 = tpu.matmul %103, %104, %cst_71 {dimension_numbers = #tpu.dot_dimension_numbers<[1], [1], [0], [0], [0, 0, 1, 0], [], []>} : vector<16x8xbf16>, vector<16x8xbf16>, vector<16x16xf32> -> vector<16x16xf32>
    %cst_72 = arith.constant dense<0xFF800000> : vector<16xf32>
    %106 = vector.multi_reduction <maximumf>, %105, %cst_72 [1] : vector<16x16xf32> to vector<16xf32>
    %107 = vector.shape_cast %106 : vector<16xf32> to vector<16x1xf32>
    %108 = vector.broadcast %107 : vector<16x1xf32> to vector<16x16xf32>
    %109 = arith.subf %105, %108 : vector<16x16xf32>
    %110 = math.exp %109 : vector<16x16xf32>
    %cst_73 = arith.constant dense<0.000000e+00> : vector<16xf32>
    %111 = vector.multi_reduction <add>, %110, %cst_73 [1] : vector<16x16xf32> to vector<16xf32>
    %112 = vector.shape_cast %111 : vector<16xf32> to vector<16x1xf32>
    %113 = arith.truncf %110 : vector<16x16xf32> to vector<16x16xbf16>
    %114 = arith.truncf %102 : vector<16x8xf32> to vector<16x8xbf16>
    %cst_74 = arith.constant dense<0.000000e+00> : vector<16x8xf32>
    %115 = tpu.matmul %113, %114, %cst_74 {dimension_numbers = #tpu.dot_dimension_numbers<[1], [0], [0], [1], [0, 0, 1, 1], [], []>} : vector<16x16xbf16>, vector<16x8xbf16>, vector<16x8xf32> -> vector<16x8xf32>
    %116 = tpu.reciprocal %112 {approx = true} : vector<16x1xf32> -> vector<16x1xf32>
    %117 = vector.broadcast %116 : vector<16x1xf32> to vector<16x8xf32>
    %118 = arith.mulf %115, %117 : vector<16x8xf32>
    %119 = arith.truncf %118 : vector<16x8xf32> to vector<16x8xbf16>
    %c3_75 = arith.constant 3 : index
    %c0_76 = arith.constant 0 : index
    %c0_77 = arith.constant 0 : index
    %120 = vector.load %arg5[%c3_75, %c0_76, %c0_77] : memref<8x8x64xbf16, #tpu.memory_space<vmem>>, vector<1x8x64xbf16>
    %121 = vector.shape_cast %120 : vector<1x8x64xbf16> to vector<8x64xbf16>
    %cst_78 = arith.constant dense<0.000000e+00> : vector<16x64xf32>
    %122 = tpu.matmul %119, %121, %cst_78 {dimension_numbers = #tpu.dot_dimension_numbers<[1], [0], [0], [1], [0, 0, 1, 1], [], []>} : vector<16x8xbf16>, vector<8x64xbf16>, vector<16x64xf32> -> vector<16x64xf32>
    %123 = arith.addf %93, %122 : vector<16x64xf32>
    %c4 = arith.constant 4 : index
    %c0_79 = arith.constant 0 : index
    %c0_80 = arith.constant 0 : index
    %124 = vector.load %arg2[%c4, %c0_79, %c0_80] : memref<8x64x8xbf16, #tpu.memory_space<vmem>>, vector<1x64x8xbf16>
    %125 = vector.shape_cast %124 : vector<1x64x8xbf16> to vector<64x8xbf16>
    %cst_81 = arith.constant dense<0.000000e+00> : vector<16x8xf32>
    %126 = tpu.matmul %2, %125, %cst_81 {dimension_numbers = #tpu.dot_dimension_numbers<[1], [0], [0], [1], [0, 0, 1, 1], [], []>} : vector<16x64xbf16>, vector<64x8xbf16>, vector<16x8xf32> -> vector<16x8xf32>
    %c4_82 = arith.constant 4 : index
    %c0_83 = arith.constant 0 : index
    %c0_84 = arith.constant 0 : index
    %127 = vector.load %arg3[%c4_82, %c0_83, %c0_84] : memref<8x64x8xbf16, #tpu.memory_space<vmem>>, vector<1x64x8xbf16>
    %128 = vector.shape_cast %127 : vector<1x64x8xbf16> to vector<64x8xbf16>
    %cst_85 = arith.constant dense<0.000000e+00> : vector<16x8xf32>
    %129 = tpu.matmul %2, %128, %cst_85 {dimension_numbers = #tpu.dot_dimension_numbers<[1], [0], [0], [1], [0, 0, 1, 1], [], []>} : vector<16x64xbf16>, vector<64x8xbf16>, vector<16x8xf32> -> vector<16x8xf32>
    %c4_86 = arith.constant 4 : index
    %c0_87 = arith.constant 0 : index
    %c0_88 = arith.constant 0 : index
    %130 = vector.load %arg4[%c4_86, %c0_87, %c0_88] : memref<8x64x8xbf16, #tpu.memory_space<vmem>>, vector<1x64x8xbf16>
    %131 = vector.shape_cast %130 : vector<1x64x8xbf16> to vector<64x8xbf16>
    %cst_89 = arith.constant dense<0.000000e+00> : vector<16x8xf32>
    %132 = tpu.matmul %2, %131, %cst_89 {dimension_numbers = #tpu.dot_dimension_numbers<[1], [0], [0], [1], [0, 0, 1, 1], [], []>} : vector<16x64xbf16>, vector<64x8xbf16>, vector<16x8xf32> -> vector<16x8xf32>
    %133 = arith.truncf %126 : vector<16x8xf32> to vector<16x8xbf16>
    %134 = arith.truncf %129 : vector<16x8xf32> to vector<16x8xbf16>
    %cst_90 = arith.constant dense<0.000000e+00> : vector<16x16xf32>
    %135 = tpu.matmul %133, %134, %cst_90 {dimension_numbers = #tpu.dot_dimension_numbers<[1], [1], [0], [0], [0, 0, 1, 0], [], []>} : vector<16x8xbf16>, vector<16x8xbf16>, vector<16x16xf32> -> vector<16x16xf32>
    %cst_91 = arith.constant dense<0xFF800000> : vector<16xf32>
    %136 = vector.multi_reduction <maximumf>, %135, %cst_91 [1] : vector<16x16xf32> to vector<16xf32>
    %137 = vector.shape_cast %136 : vector<16xf32> to vector<16x1xf32>
    %138 = vector.broadcast %137 : vector<16x1xf32> to vector<16x16xf32>
    %139 = arith.subf %135, %138 : vector<16x16xf32>
    %140 = math.exp %139 : vector<16x16xf32>
    %cst_92 = arith.constant dense<0.000000e+00> : vector<16xf32>
    %141 = vector.multi_reduction <add>, %140, %cst_92 [1] : vector<16x16xf32> to vector<16xf32>
    %142 = vector.shape_cast %141 : vector<16xf32> to vector<16x1xf32>
    %143 = arith.truncf %140 : vector<16x16xf32> to vector<16x16xbf16>
    %144 = arith.truncf %132 : vector<16x8xf32> to vector<16x8xbf16>
    %cst_93 = arith.constant dense<0.000000e+00> : vector<16x8xf32>
    %145 = tpu.matmul %143, %144, %cst_93 {dimension_numbers = #tpu.dot_dimension_numbers<[1], [0], [0], [1], [0, 0, 1, 1], [], []>} : vector<16x16xbf16>, vector<16x8xbf16>, vector<16x8xf32> -> vector<16x8xf32>
    %146 = tpu.reciprocal %142 {approx = true} : vector<16x1xf32> -> vector<16x1xf32>
    %147 = vector.broadcast %146 : vector<16x1xf32> to vector<16x8xf32>
    %148 = arith.mulf %145, %147 : vector<16x8xf32>
    %149 = arith.truncf %148 : vector<16x8xf32> to vector<16x8xbf16>
    %c4_94 = arith.constant 4 : index
    %c0_95 = arith.constant 0 : index
    %c0_96 = arith.constant 0 : index
    %150 = vector.load %arg5[%c4_94, %c0_95, %c0_96] : memref<8x8x64xbf16, #tpu.memory_space<vmem>>, vector<1x8x64xbf16>
    %151 = vector.shape_cast %150 : vector<1x8x64xbf16> to vector<8x64xbf16>
    %cst_97 = arith.constant dense<0.000000e+00> : vector<16x64xf32>
    %152 = tpu.matmul %149, %151, %cst_97 {dimension_numbers = #tpu.dot_dimension_numbers<[1], [0], [0], [1], [0, 0, 1, 1], [], []>} : vector<16x8xbf16>, vector<8x64xbf16>, vector<16x64xf32> -> vector<16x64xf32>
    %153 = arith.addf %123, %152 : vector<16x64xf32>
    %c5 = arith.constant 5 : index
    %c0_98 = arith.constant 0 : index
    %c0_99 = arith.constant 0 : index
    %154 = vector.load %arg2[%c5, %c0_98, %c0_99] : memref<8x64x8xbf16, #tpu.memory_space<vmem>>, vector<1x64x8xbf16>
    %155 = vector.shape_cast %154 : vector<1x64x8xbf16> to vector<64x8xbf16>
    %cst_100 = arith.constant dense<0.000000e+00> : vector<16x8xf32>
    %156 = tpu.matmul %2, %155, %cst_100 {dimension_numbers = #tpu.dot_dimension_numbers<[1], [0], [0], [1], [0, 0, 1, 1], [], []>} : vector<16x64xbf16>, vector<64x8xbf16>, vector<16x8xf32> -> vector<16x8xf32>
    %c5_101 = arith.constant 5 : index
    %c0_102 = arith.constant 0 : index
    %c0_103 = arith.constant 0 : index
    %157 = vector.load %arg3[%c5_101, %c0_102, %c0_103] : memref<8x64x8xbf16, #tpu.memory_space<vmem>>, vector<1x64x8xbf16>
    %158 = vector.shape_cast %157 : vector<1x64x8xbf16> to vector<64x8xbf16>
    %cst_104 = arith.constant dense<0.000000e+00> : vector<16x8xf32>
    %159 = tpu.matmul %2, %158, %cst_104 {dimension_numbers = #tpu.dot_dimension_numbers<[1], [0], [0], [1], [0, 0, 1, 1], [], []>} : vector<16x64xbf16>, vector<64x8xbf16>, vector<16x8xf32> -> vector<16x8xf32>
    %c5_105 = arith.constant 5 : index
    %c0_106 = arith.constant 0 : index
    %c0_107 = arith.constant 0 : index
    %160 = vector.load %arg4[%c5_105, %c0_106, %c0_107] : memref<8x64x8xbf16, #tpu.memory_space<vmem>>, vector<1x64x8xbf16>
    %161 = vector.shape_cast %160 : vector<1x64x8xbf16> to vector<64x8xbf16>
    %cst_108 = arith.constant dense<0.000000e+00> : vector<16x8xf32>
    %162 = tpu.matmul %2, %161, %cst_108 {dimension_numbers = #tpu.dot_dimension_numbers<[1], [0], [0], [1], [0, 0, 1, 1], [], []>} : vector<16x64xbf16>, vector<64x8xbf16>, vector<16x8xf32> -> vector<16x8xf32>
    %163 = arith.truncf %156 : vector<16x8xf32> to vector<16x8xbf16>
    %164 = arith.truncf %159 : vector<16x8xf32> to vector<16x8xbf16>
    %cst_109 = arith.constant dense<0.000000e+00> : vector<16x16xf32>
    %165 = tpu.matmul %163, %164, %cst_109 {dimension_numbers = #tpu.dot_dimension_numbers<[1], [1], [0], [0], [0, 0, 1, 0], [], []>} : vector<16x8xbf16>, vector<16x8xbf16>, vector<16x16xf32> -> vector<16x16xf32>
    %cst_110 = arith.constant dense<0xFF800000> : vector<16xf32>
    %166 = vector.multi_reduction <maximumf>, %165, %cst_110 [1] : vector<16x16xf32> to vector<16xf32>
    %167 = vector.shape_cast %166 : vector<16xf32> to vector<16x1xf32>
    %168 = vector.broadcast %167 : vector<16x1xf32> to vector<16x16xf32>
    %169 = arith.subf %165, %168 : vector<16x16xf32>
    %170 = math.exp %169 : vector<16x16xf32>
    %cst_111 = arith.constant dense<0.000000e+00> : vector<16xf32>
    %171 = vector.multi_reduction <add>, %170, %cst_111 [1] : vector<16x16xf32> to vector<16xf32>
    %172 = vector.shape_cast %171 : vector<16xf32> to vector<16x1xf32>
    %173 = arith.truncf %170 : vector<16x16xf32> to vector<16x16xbf16>
    %174 = arith.truncf %162 : vector<16x8xf32> to vector<16x8xbf16>
    %cst_112 = arith.constant dense<0.000000e+00> : vector<16x8xf32>
    %175 = tpu.matmul %173, %174, %cst_112 {dimension_numbers = #tpu.dot_dimension_numbers<[1], [0], [0], [1], [0, 0, 1, 1], [], []>} : vector<16x16xbf16>, vector<16x8xbf16>, vector<16x8xf32> -> vector<16x8xf32>
    %176 = tpu.reciprocal %172 {approx = true} : vector<16x1xf32> -> vector<16x1xf32>
    %177 = vector.broadcast %176 : vector<16x1xf32> to vector<16x8xf32>
    %178 = arith.mulf %175, %177 : vector<16x8xf32>
    %179 = arith.truncf %178 : vector<16x8xf32> to vector<16x8xbf16>
    %c5_113 = arith.constant 5 : index
    %c0_114 = arith.constant 0 : index
    %c0_115 = arith.constant 0 : index
    %180 = vector.load %arg5[%c5_113, %c0_114, %c0_115] : memref<8x8x64xbf16, #tpu.memory_space<vmem>>, vector<1x8x64xbf16>
    %181 = vector.shape_cast %180 : vector<1x8x64xbf16> to vector<8x64xbf16>
    %cst_116 = arith.constant dense<0.000000e+00> : vector<16x64xf32>
    %182 = tpu.matmul %179, %181, %cst_116 {dimension_numbers = #tpu.dot_dimension_numbers<[1], [0], [0], [1], [0, 0, 1, 1], [], []>} : vector<16x8xbf16>, vector<8x64xbf16>, vector<16x64xf32> -> vector<16x64xf32>
    %183 = arith.addf %153, %182 : vector<16x64xf32>
    %c6 = arith.constant 6 : index
    %c0_117 = arith.constant 0 : index
    %c0_118 = arith.constant 0 : index
    %184 = vector.load %arg2[%c6, %c0_117, %c0_118] : memref<8x64x8xbf16, #tpu.memory_space<vmem>>, vector<1x64x8xbf16>
    %185 = vector.shape_cast %184 : vector<1x64x8xbf16> to vector<64x8xbf16>
    %cst_119 = arith.constant dense<0.000000e+00> : vector<16x8xf32>
    %186 = tpu.matmul %2, %185, %cst_119 {dimension_numbers = #tpu.dot_dimension_numbers<[1], [0], [0], [1], [0, 0, 1, 1], [], []>} : vector<16x64xbf16>, vector<64x8xbf16>, vector<16x8xf32> -> vector<16x8xf32>
    %c6_120 = arith.constant 6 : index
    %c0_121 = arith.constant 0 : index
    %c0_122 = arith.constant 0 : index
    %187 = vector.load %arg3[%c6_120, %c0_121, %c0_122] : memref<8x64x8xbf16, #tpu.memory_space<vmem>>, vector<1x64x8xbf16>
    %188 = vector.shape_cast %187 : vector<1x64x8xbf16> to vector<64x8xbf16>
    %cst_123 = arith.constant dense<0.000000e+00> : vector<16x8xf32>
    %189 = tpu.matmul %2, %188, %cst_123 {dimension_numbers = #tpu.dot_dimension_numbers<[1], [0], [0], [1], [0, 0, 1, 1], [], []>} : vector<16x64xbf16>, vector<64x8xbf16>, vector<16x8xf32> -> vector<16x8xf32>
    %c6_124 = arith.constant 6 : index
    %c0_125 = arith.constant 0 : index
    %c0_126 = arith.constant 0 : index
    %190 = vector.load %arg4[%c6_124, %c0_125, %c0_126] : memref<8x64x8xbf16, #tpu.memory_space<vmem>>, vector<1x64x8xbf16>
    %191 = vector.shape_cast %190 : vector<1x64x8xbf16> to vector<64x8xbf16>
    %cst_127 = arith.constant dense<0.000000e+00> : vector<16x8xf32>
    %192 = tpu.matmul %2, %191, %cst_127 {dimension_numbers = #tpu.dot_dimension_numbers<[1], [0], [0], [1], [0, 0, 1, 1], [], []>} : vector<16x64xbf16>, vector<64x8xbf16>, vector<16x8xf32> -> vector<16x8xf32>
    %193 = arith.truncf %186 : vector<16x8xf32> to vector<16x8xbf16>
    %194 = arith.truncf %189 : vector<16x8xf32> to vector<16x8xbf16>
    %cst_128 = arith.constant dense<0.000000e+00> : vector<16x16xf32>
    %195 = tpu.matmul %193, %194, %cst_128 {dimension_numbers = #tpu.dot_dimension_numbers<[1], [1], [0], [0], [0, 0, 1, 0], [], []>} : vector<16x8xbf16>, vector<16x8xbf16>, vector<16x16xf32> -> vector<16x16xf32>
    %cst_129 = arith.constant dense<0xFF800000> : vector<16xf32>
    %196 = vector.multi_reduction <maximumf>, %195, %cst_129 [1] : vector<16x16xf32> to vector<16xf32>
    %197 = vector.shape_cast %196 : vector<16xf32> to vector<16x1xf32>
    %198 = vector.broadcast %197 : vector<16x1xf32> to vector<16x16xf32>
    %199 = arith.subf %195, %198 : vector<16x16xf32>
    %200 = math.exp %199 : vector<16x16xf32>
    %cst_130 = arith.constant dense<0.000000e+00> : vector<16xf32>
    %201 = vector.multi_reduction <add>, %200, %cst_130 [1] : vector<16x16xf32> to vector<16xf32>
    %202 = vector.shape_cast %201 : vector<16xf32> to vector<16x1xf32>
    %203 = arith.truncf %200 : vector<16x16xf32> to vector<16x16xbf16>
    %204 = arith.truncf %192 : vector<16x8xf32> to vector<16x8xbf16>
    %cst_131 = arith.constant dense<0.000000e+00> : vector<16x8xf32>
    %205 = tpu.matmul %203, %204, %cst_131 {dimension_numbers = #tpu.dot_dimension_numbers<[1], [0], [0], [1], [0, 0, 1, 1], [], []>} : vector<16x16xbf16>, vector<16x8xbf16>, vector<16x8xf32> -> vector<16x8xf32>
    %206 = tpu.reciprocal %202 {approx = true} : vector<16x1xf32> -> vector<16x1xf32>
    %207 = vector.broadcast %206 : vector<16x1xf32> to vector<16x8xf32>
    %208 = arith.mulf %205, %207 : vector<16x8xf32>
    %209 = arith.truncf %208 : vector<16x8xf32> to vector<16x8xbf16>
    %c6_132 = arith.constant 6 : index
    %c0_133 = arith.constant 0 : index
    %c0_134 = arith.constant 0 : index
    %210 = vector.load %arg5[%c6_132, %c0_133, %c0_134] : memref<8x8x64xbf16, #tpu.memory_space<vmem>>, vector<1x8x64xbf16>
    %211 = vector.shape_cast %210 : vector<1x8x64xbf16> to vector<8x64xbf16>
    %cst_135 = arith.constant dense<0.000000e+00> : vector<16x64xf32>
    %212 = tpu.matmul %209, %211, %cst_135 {dimension_numbers = #tpu.dot_dimension_numbers<[1], [0], [0], [1], [0, 0, 1, 1], [], []>} : vector<16x8xbf16>, vector<8x64xbf16>, vector<16x64xf32> -> vector<16x64xf32>
    %213 = arith.addf %183, %212 : vector<16x64xf32>
    %c7 = arith.constant 7 : index
    %c0_136 = arith.constant 0 : index
    %c0_137 = arith.constant 0 : index
    %214 = vector.load %arg2[%c7, %c0_136, %c0_137] : memref<8x64x8xbf16, #tpu.memory_space<vmem>>, vector<1x64x8xbf16>
    %215 = vector.shape_cast %214 : vector<1x64x8xbf16> to vector<64x8xbf16>
    %cst_138 = arith.constant dense<0.000000e+00> : vector<16x8xf32>
    %216 = tpu.matmul %2, %215, %cst_138 {dimension_numbers = #tpu.dot_dimension_numbers<[1], [0], [0], [1], [0, 0, 1, 1], [], []>} : vector<16x64xbf16>, vector<64x8xbf16>, vector<16x8xf32> -> vector<16x8xf32>
    %c7_139 = arith.constant 7 : index
    %c0_140 = arith.constant 0 : index
    %c0_141 = arith.constant 0 : index
    %217 = vector.load %arg3[%c7_139, %c0_140, %c0_141] : memref<8x64x8xbf16, #tpu.memory_space<vmem>>, vector<1x64x8xbf16>
    %218 = vector.shape_cast %217 : vector<1x64x8xbf16> to vector<64x8xbf16>
    %cst_142 = arith.constant dense<0.000000e+00> : vector<16x8xf32>
    %219 = tpu.matmul %2, %218, %cst_142 {dimension_numbers = #tpu.dot_dimension_numbers<[1], [0], [0], [1], [0, 0, 1, 1], [], []>} : vector<16x64xbf16>, vector<64x8xbf16>, vector<16x8xf32> -> vector<16x8xf32>
    %c7_143 = arith.constant 7 : index
    %c0_144 = arith.constant 0 : index
    %c0_145 = arith.constant 0 : index
    %220 = vector.load %arg4[%c7_143, %c0_144, %c0_145] : memref<8x64x8xbf16, #tpu.memory_space<vmem>>, vector<1x64x8xbf16>
    %221 = vector.shape_cast %220 : vector<1x64x8xbf16> to vector<64x8xbf16>
    %cst_146 = arith.constant dense<0.000000e+00> : vector<16x8xf32>
    %222 = tpu.matmul %2, %221, %cst_146 {dimension_numbers = #tpu.dot_dimension_numbers<[1], [0], [0], [1], [0, 0, 1, 1], [], []>} : vector<16x64xbf16>, vector<64x8xbf16>, vector<16x8xf32> -> vector<16x8xf32>
    %223 = arith.truncf %216 : vector<16x8xf32> to vector<16x8xbf16>
    %224 = arith.truncf %219 : vector<16x8xf32> to vector<16x8xbf16>
    %cst_147 = arith.constant dense<0.000000e+00> : vector<16x16xf32>
    %225 = tpu.matmul %223, %224, %cst_147 {dimension_numbers = #tpu.dot_dimension_numbers<[1], [1], [0], [0], [0, 0, 1, 0], [], []>} : vector<16x8xbf16>, vector<16x8xbf16>, vector<16x16xf32> -> vector<16x16xf32>
    %cst_148 = arith.constant dense<0xFF800000> : vector<16xf32>
    %226 = vector.multi_reduction <maximumf>, %225, %cst_148 [1] : vector<16x16xf32> to vector<16xf32>
    %227 = vector.shape_cast %226 : vector<16xf32> to vector<16x1xf32>
    %228 = vector.broadcast %227 : vector<16x1xf32> to vector<16x16xf32>
    %229 = arith.subf %225, %228 : vector<16x16xf32>
    %230 = math.exp %229 : vector<16x16xf32>
    %cst_149 = arith.constant dense<0.000000e+00> : vector<16xf32>
    %231 = vector.multi_reduction <add>, %230, %cst_149 [1] : vector<16x16xf32> to vector<16xf32>
    %232 = vector.shape_cast %231 : vector<16xf32> to vector<16x1xf32>
    %233 = arith.truncf %230 : vector<16x16xf32> to vector<16x16xbf16>
    %234 = arith.truncf %222 : vector<16x8xf32> to vector<16x8xbf16>
    %cst_150 = arith.constant dense<0.000000e+00> : vector<16x8xf32>
    %235 = tpu.matmul %233, %234, %cst_150 {dimension_numbers = #tpu.dot_dimension_numbers<[1], [0], [0], [1], [0, 0, 1, 1], [], []>} : vector<16x16xbf16>, vector<16x8xbf16>, vector<16x8xf32> -> vector<16x8xf32>
    %236 = tpu.reciprocal %232 {approx = true} : vector<16x1xf32> -> vector<16x1xf32>
    %237 = vector.broadcast %236 : vector<16x1xf32> to vector<16x8xf32>
    %238 = arith.mulf %235, %237 : vector<16x8xf32>
    %239 = arith.truncf %238 : vector<16x8xf32> to vector<16x8xbf16>
    %c7_151 = arith.constant 7 : index
    %c0_152 = arith.constant 0 : index
    %c0_153 = arith.constant 0 : index
    %240 = vector.load %arg5[%c7_151, %c0_152, %c0_153] : memref<8x8x64xbf16, #tpu.memory_space<vmem>>, vector<1x8x64xbf16>
    %241 = vector.shape_cast %240 : vector<1x8x64xbf16> to vector<8x64xbf16>
    %cst_154 = arith.constant dense<0.000000e+00> : vector<16x64xf32>
    %242 = tpu.matmul %239, %241, %cst_154 {dimension_numbers = #tpu.dot_dimension_numbers<[1], [0], [0], [1], [0, 0, 1, 1], [], []>} : vector<16x8xbf16>, vector<8x64xbf16>, vector<16x64xf32> -> vector<16x64xf32>
    %243 = arith.addf %213, %242 : vector<16x64xf32>
    %c0_155 = arith.constant 0 : index
    %c0_156 = arith.constant 0 : index
    %244 = vector.load %arg6[%c0_155, %c0_156] : memref<1x64xf32, #tpu.memory_space<vmem>>, vector<1x64xf32>
    %245 = vector.broadcast %244 : vector<1x64xf32> to vector<16x64xf32>
    %246 = arith.addf %243, %245 : vector<16x64xf32>
    %c0_157 = arith.constant 0 : index
    %c0_158 = arith.constant 0 : index
    %c0_159 = arith.constant 0 : index
    %247 = vector.load %arg7[%c0_157, %c0_158, %c0_159] : memref<1x16x64xf32, #tpu.memory_space<vmem>>, vector<1x16x64xf32>
    %248 = vector.shape_cast %247 : vector<1x16x64xf32> to vector<16x64xf32>
    %249 = vector.shape_cast %246 : vector<16x64xf32> to vector<1x16x64xf32>
    tpu.vector_store %arg7[%c0_157, %c0_158, %c0_159], %249 {strides = array<i32>} : memref<1x16x64xf32, #tpu.memory_space<vmem>>, vector<1x16x64xf32>,
    return
  }
  func.func @transform_0(%arg0: i32) -> (i32, i32, i32) {
    %c0_i32 = arith.constant 0 : i32
    %c0_i32_0 = arith.constant 0 : i32
    %c0_i32_1 = arith.constant 0 : i32
    return %arg0, %c0_i32, %c0_i32_0 : i32, i32, i32
  }
  func.func @transform_1(%arg0: i32) -> (i32, i32, i32) {
    %c0_i32 = arith.constant 0 : i32
    %c0_i32_0 = arith.constant 0 : i32
    %c0_i32_1 = arith.constant 0 : i32
    %c0_i32_2 = arith.constant 0 : i32
    return %c0_i32, %c0_i32_0, %c0_i32_1 : i32, i32, i32
  }
  func.func @transform_2(%arg0: i32) -> (i32, i32, i32) {
    %c0_i32 = arith.constant 0 : i32
    %c0_i32_0 = arith.constant 0 : i32
    %c0_i32_1 = arith.constant 0 : i32
    %c0_i32_2 = arith.constant 0 : i32
    return %c0_i32, %c0_i32_0, %c0_i32_1 : i32, i32, i32
  }
  func.func @transform_3(%arg0: i32) -> (i32, i32, i32) {
    %c0_i32 = arith.constant 0 : i32
    %c0_i32_0 = arith.constant 0 : i32
    %c0_i32_1 = arith.constant 0 : i32
    %c0_i32_2 = arith.constant 0 : i32
    return %c0_i32, %c0_i32_0, %c0_i32_1 : i32, i32, i32
  }
  func.func @transform_4(%arg0: i32) -> (i32, i32, i32) {
    %c0_i32 = arith.constant 0 : i32
    %c0_i32_0 = arith.constant 0 : i32
    %c0_i32_1 = arith.constant 0 : i32
    %c0_i32_2 = arith.constant 0 : i32
    return %c0_i32, %c0_i32_0, %c0_i32_1 : i32, i32, i32
  }
  func.func @transform_5(%arg0: i32) -> (i32, i32) {
    %c0_i32 = arith.constant 0 : i32
    %c0_i32_0 = arith.constant 0 : i32
    %c0_i32_1 = arith.constant 0 : i32
    return %c0_i32, %c0_i32_0 : i32, i32
  }
  func.func @transform_6(%arg0: i32) -> (i32, i32, i32) {
    %c0_i32 = arith.constant 0 : i32
    %c0_i32_0 = arith.constant 0 : i32
    %c0_i32_1 = arith.constant 0 : i32
    return %arg0, %c0_i32, %c0_i32_0 : i32, i32, i32
  }
}

</mosaic_0001>

<bundles_post_ra>
// kernel: tpu_custom_call.1
= control target key start
LH: loop header
LB: loop body
LE: loop exit
PB: predicated region body
PF: predicated region fallthrough
CT: control target
= control target key end

     0   :  { %11 = vsyncpa [#allocation3], 0  ;;  %s5503_s0 = inlined_call_operand.vmem [shape: f32[2,16,64], index: 0, kind: input, shape index: {}]   ;;  %s5504_s1 = inlined_call_operand.vmem [shape: bf16[8,64,8], index: 1, kind: input, shape index: {}]   ;;  %s5505_s2 = inlined_call_operand.vmem [shape: bf16[8,64,8], index: 2, kind: input, shape index: {}]   ;;  %s5506_s3 = inlined_call_operand.vmem [shape: bf16[8,64,8], index: 3, kind: input, shape index: {}]   ;;  %s5507_s4 = inlined_call_operand.vmem [shape: bf16[8,8,64], index: 4, kind: input, shape index: {}]   ;;  %s5508_s5 = inlined_call_operand.vmem [shape: f32[1,64], index: 5, kind: input, shape index: {}]   ;;  %s5509_s6 = inlined_call_operand.hbm [shape: f32[2,16,64], index: 6, kind: output, shape index: {}]  }
   0x1   :  { %13 = vsyncpa [#allocation3 + $0x1], 0  ;;  %s4709_s21 = smov 0   ;;  %s4711_s22 = smov 0  }
   0x2   :  { %s4713_s23 = smov 0   ;;  %s4715_s24 = smov 0  }
   0x3 LB: > { %s4730_s25 = sadd.s32 4294967295, %s4667_s24   ;;  %s3468_s26 = sadd.s32 4294967294, %s4667_s24   ;;  %s4667_s24 = sphi %s4715_s24, %s5515_s24   ;;  %s4663_s23 = sphi %s4713_s23, %s5514_s23   ;;  %s4659_s22 = sphi %s4711_s22, %s5513_s22   ;;  %s4655_s21 = sphi %s4709_s21, %s5512_s21  }
   0x4   : > { %s4734_s27 = sadd.s32 1, %s4667_s24   ;;  %s157_s28 = sadd.s32 1, %s4663_s23 }
   0x5   : > { %s154_s29 = ssub.s32 %s4667_s24, %s4734_s27  ;;  %p167_p0 = scmp.ne.s32.totalorder %s4663_s23, %s4659_s22 }
   0x6   : > { %p155_p1 = scmp.eq.s32.totalorder %s154_s29, 0  ;;  %p168_p2 = scmp.eq.s32.totalorder %s4730_s25, 1 }
   0x7   : > { %p173_p3 = scmp.ne.s32.totalorder %s4659_s22, %s4655_s21  ;;  %p174_p4 = scmp.eq.s32.totalorder %s3468_s26, 1 }
   0x8   : > { %s4745_s30 = scalar_select %p155_p1, %s4663_s23, %s157_s28  }
   0x9   : > { %p4747_p5 = por %p168_p2, %p167_p0  ;;  %p4751_p6 = por %p174_p4, %p173_p3 }
   0xa   : > { %p3471_p7 = scmp.ge.s32.totalorder %s4667_s24, 1  ;;  %p215_p8 = scmp.lt.s32.totalorder %s4667_s24, 3 }
   0xc   : > { %p216_p9 = pnand %p3471_p7, %p215_p8 }
   0xd   : > { %v4445_v0 = vld [vmem:[%s5505_s2] sm:$0xff] (!%p216_p9)   ;;  %v4669_v1 = vmov (!%p216_p9), 0.0   ;;  %v4446_v2 = vld [vmem:[%s5505_s2 + $0x8] sm:$0xff] (!%p216_p9)   ;;  %vm4670_vm0 = vmmov (!%p216_p9), 0   ;;  %p245_p10 = scmp.lt.s32.totalorder (!%p216_p9), %s4730_s25, 1  ;;  %v4448_v5 = vld [vmem:[%s5505_s2 + $0x10] sm:$0xff] (!%p216_p9)  }
   0xe   : > { %219 = sbr.rel (%p216_p9) target bundleno = 6681 (0x1a19), region = 44  ;;  %3982 = vmatprep.subr.bf16.mxu1 (!%p216_p9), %v4669_v1  ;;  %3970 = vmatprep.subr.bf16.mxu0 (!%p216_p9), %v4669_v1  ;;  %v4447_v3 = vld [vmem:[%s5504_s1] sm:$0xff] (!%p216_p9)   ;;  %v4449_v4 = vld [vmem:[%s5504_s1 + $0x8] sm:$0xff] (!%p216_p9)   ;;  %v4451_v6 = vld [vmem:[%s5504_s1 + $0x10] sm:$0xff] (!%p216_p9)   ;;  %vm286_vm1 = vcmask (!%p216_p9), 523264   ;;  %vm479_vm2 = vcmask (!%p216_p9), 64512  }
   0xf   : > { %3983 = vmatpush3.bf16.msra.mxu1 (!%p216_p9), %v4445_v0  ;;  %3990 = vmatprep.mubr.msk.bf16.mxu1 (!%p216_p9), %vm4670_vm0, %v4669_v1  ;;  %v4450_v7 = vld [vmem:[%s5505_s2 + $0x18] sm:$0xff] (!%p216_p9)   ;;  %v4453_v12 = vld [vmem:[%s5506_s3] sm:$0xff] (!%p216_p9)   ;;  %v4454_v13 = vld [vmem:[%s5506_s3 + $0x8] sm:$0xff] (!%p216_p9)   ;;  %vm527_vm3 = vcmask (!%p216_p9), 130048   ;;  %vm943_vm4 = vcmask (!%p216_p9), 1043456   ;;  %s242_s12 = sand.u32 (!%p216_p9), 1, %s4659_s22  }
  0x10   : > { %3984 = vmatprep.subr.bf16.mxu1 (!%p216_p9), %v4669_v1  ;;  %3978 = vmatprep.mubr.msk.bf16.mxu0 (!%p216_p9), %vm4670_vm0, %v4669_v1  ;;  %v4452_v10 = vld [vmem:[%s5504_s1 + $0x18] sm:$0xff] (!%p216_p9)   ;;  %v4455_v14 = vld [vmem:[%s5506_s3 + $0x10] sm:$0xff] (!%p216_p9)   ;;  %v4459_v38 = vld [vmem:[%s5504_s1 + $0x20] sm:$0xff] (!%p216_p9)   ;;  %s3472_s13 = sshll.u32 (!%p216_p9), %s242_s12, 4  ;;  %s3801_s18 = sshll.u32 (!%p216_p9), %s4730_s25, 8 }
  0x11   : > { %3971 = vmatpush3.bf16.msra.mxu0 (!%p216_p9), %v4447_v3  ;;  %v4456_v15 = vld [vmem:[%s5506_s3 + $0x18] sm:$0xff] (!%p216_p9)   ;;  %v4461_v39 = vld [vmem:[%s5504_s1 + $0x28] sm:$0xff] (!%p216_p9)   ;;  %v4463_v40 = vld [vmem:[%s5504_s1 + $0x30] sm:$0xff] (!%p216_p9)   ;;  %s244_s16 = scalar_lea.vmem (!%p216_p9), [#allocation2], %s3472_s13  ;;  %s5456_s26 = scalar_lea.hbm (!%p216_p9), %s5509_s6, %s3801_s18 }
  0x12   : > { %3972 = vmatprep.subr.bf16.mxu0 (!%p216_p9), %v4669_v1  ;;  %v4464_v41 = vld [vmem:[%s5504_s1 + $0x38] sm:$0xff] (!%p216_p9)   ;;  %v4457_v51 = vld [vmem:[%s5505_s2 + $0x20] sm:$0xff] (!%p216_p9)   ;;  %v4458_v53 = vld [vmem:[%s5505_s2 + $0x28] sm:$0xff] (!%p216_p9)   ;;  %s4671_s29 = smov (!%p216_p9), [#allocation2]  }
  0x13   : > { %3985 = vmatpush3.bf16.msra.mxu1 (!%p216_p9), %v4446_v2  ;;  %v4460_v54 = vld [vmem:[%s5505_s2 + $0x30] sm:$0xff] (!%p216_p9)   ;;  %v4462_v55 = vld [vmem:[%s5505_s2 + $0x38] sm:$0xff] (!%p216_p9)   ;;  %v4465_v61 = vld [vmem:[%s5506_s3 + $0x20] sm:$0xff] (!%p216_p9)   ;;  %s4609_s9 = sshll.u32 (!%p216_p9), %s4671_s29, 4  ;;  %s4610_s9 = int_to_ptr.vmem [resolvable:$false] %s4609_s9 }
  0x14   : > { %3986 = vmatprep.subr.bf16.mxu1 (!%p216_p9), %v4669_v1  ;;  %v4466_v62 = vld [vmem:[%s5506_s3 + $0x28] sm:$0xff] (!%p216_p9)   ;;  %v4467_v63 = vld [vmem:[%s5506_s3 + $0x30] sm:$0xff] (!%p216_p9)   ;;  %v4468_v0 = vld [vmem:[%s5506_s3 + $0x38] sm:$0xff] (!%p216_p9)  }
  0x15   : > { %s246_s17 = scalar_select %p245_p10, %s4730_s25, 1  ;;  %3973 = vmatpush3.bf16.msra.mxu0 %v4449_v4 }
  0x16   : > { %3974 = vmatprep.subr.bf16.mxu0 %v4669_v1  ;;  %s5462_s25 = scalar_lea.sflag [#allocation3], %s242_s12 }
  0x17   : > { %s3800_s20 = sshll.u32 %s246_s17, 4  ;;  %3987 = vmatpush3.bf16.msra.mxu1 %v4448_v5  ;;  %s3406_s17 = sshll.u32 %s244_s16, 4  ;;  %s5458_s17 = int_to_ptr.vmem [resolvable:$true] %s3406_s17 }
  0x18   : > { %s249_s10 = scalar_lea.vmem %s5503_s0, %s3800_s20  ;;  %3988 = vmatprep.subr.bf16.mxu1 %v4669_v1  ;;  %s4605_s28 = scalar_lea.vmem %s5458_s17, 256 }
  0x19   : > { %v251_v8 = vld [vmem:[%s249_s10] sm:$0xff]  ;;  %v252_v9 = vld [vmem:[%s249_s10 + $0x8] sm:$0xff]  ;;  %3975 = vmatpush3.bf16.msra.mxu0 %v4451_v6  ;;  %p4606_p11 = scmp.ne.s32.totalorder %s5458_s17, %s4605_s28  ;;  %s4611_s10 = scalar_lea.vmem %s4610_s9, 512 }
  0x1a   : > { %v4797_v11 = vpack.c.bf16 %v252_v9, %v251_v8  ;;  %3976 = vmatprep.subr.bf16.mxu0 %v4669_v1  ;;  %p4612_p0 = scmp.lt.s32.totalorder %s5458_s17, %s4610_s9  ;;  %p4613_p1 = scmp.lt.s32.totalorder %s4611_s10, %s4605_s28 }
  0x1b   : > { %3989 = vmatpush3.bf16.msra.mxu1 %v4450_v7  ;;  %p4607_p12 = pnand %p4606_p11, %p4747_p5 }
  0x1c   : > { %4006 = vmatprep.subr.bf16.mxu1 %v4669_v1  ;;  %p4614_p2 = por %p4613_p1, %p4612_p0 }
  0x1d   : > { %3977 = vmatpush3.bf16.msra.mxu0 %v4452_v10  ;;  %p4608_p13 = pneg %p4607_p12 }
  0x1e   : > { %3991 = vmatmul.mubr.msk.bf16.vlgmr.msra.gmra.mrb[0].mxu1 %vm286_vm1, %v4797_v11  ;;  %3994 = vmatprep.subr.bf16.mxu0 %v4669_v1 }
  0x1f   : > { %4008 = vmatprep.mubr.msk.bf16.mxu1 %vm4670_vm0, %v4669_v1  ;;  %p4615_p3 = pnand %p4614_p2, %p4608_p13 }
  0x20   : > { %3979 = vmatmul.mubr.msk.bf16.vlgmr.msra.gmra.mrb[0].mxu0 %vm286_vm1, %v4797_v11 }
  0x21   : > { %4002 = vmatprep.mubr.msk.bf16.mxu0 %vm4670_vm0, %v4669_v1  ;;  %3995 = vmatpush3.bf16.msra.mxu0 %v4453_v12 }
  0x22   : > { %3996 = vmatprep.subr.bf16.mxu0 %v4669_v1 }
  0x25   : > { %3997 = vmatpush3.bf16.msra.mxu0 %v4454_v13 }
  0x26   : > { %3998 = vmatprep.subr.bf16.mxu0 %v4669_v1 }
  0x29   : > { %3999 = vmatpush3.bf16.msra.mxu0 %v4455_v14 }
  0x2a   : > { %4000 = vmatprep.subr.bf16.mxu0 %v4669_v1 }
  0x2d   : > { %4001 = vmatpush3.bf16.msra.mxu0 %v4456_v15 }
  0x2e   : > { %4018 = vmatprep.subr.bf16.mxu0 %v4669_v1 }
  0x30   : > { %4003 = vmatmul.mubr.msk.bf16.vlgmr.msra.gmra.mrb[4].mxu0 %vm286_vm1, %v4797_v11 }
  0x31   : > { %4026 = vmatprep.mubr.msk.bf16.mxu0 %vm4670_vm0, %v4669_v1  ;;  %4019 = vmatpush3.bf16.msra.mxu0 %v4459_v38 }
  0x32   : > { %4020 = vmatprep.subr.bf16.mxu0 %v4669_v1 }
  0x35   : > { %4021 = vmatpush3.bf16.msra.mxu0 %v4461_v39 }
  0x36   : > { %4022 = vmatprep.subr.bf16.mxu0 %v4669_v1 }
  0x39   : > { %4023 = vmatpush3.bf16.msra.mxu0 %v4463_v40 }
  0x3a   : > { %4024 = vmatprep.subr.bf16.mxu0 %v4669_v1 }
  0x3d   : > { %4025 = vmatpush3.bf16.msra.mxu0 %v4464_v41 }
  0x3e   : > { %4042 = vmatprep.subr.bf16.mxu0 %v4669_v1 }
  0x40   : > { %4027 = vmatmul.mubr.msk.bf16.vlgmr.msra.gmra.mrb[8].mxu0 %vm286_vm1, %v4797_v11 }
  0x41   : > { %4050 = vmatprep.mubr.msk.bf16.mxu0 %vm4670_vm0, %v4669_v1  ;;  %4043 = vmatpush3.bf16.msra.mxu0 %v4465_v61  ;;  %v4472_v61 = vld [vmem:[%s5504_s1 + $0x40] sm:$0xff]  }
  0x42   : > { %4044 = vmatprep.subr.bf16.mxu0 %v4669_v1 }
  0x45   : > { %4045 = vmatpush3.bf16.msra.mxu0 %v4466_v62 }
  0x46   : > { %4046 = vmatprep.subr.bf16.mxu0 %v4669_v1 }
  0x49   : > { %4047 = vmatpush3.bf16.msra.mxu0 %v4467_v63 }
  0x4a   : > { %4048 = vmatprep.subr.bf16.mxu0 %v4669_v1 }
  0x4d   : > { %4049 = vmatpush3.bf16.msra.mxu0 %v4468_v0  ;;  %v4474_v0 = vld [vmem:[%s5504_s1 + $0x48] sm:$0xff]  }
  0x4e   : > { %4066 = vmatprep.subr.bf16.mxu0 %v4669_v1 }
  0x50   : > { %4051 = vmatmul.mubr.msk.bf16.vlgmr.msra.gmra.mrb[12].mxu0 %vm286_vm1, %v4797_v11 }
  0x51   : > { %4068 = vmatprep.mubr.msk.bf16.mxu0 %vm4670_vm0, %v4669_v1 }
  0xf1   : > { %v397_v16 = vpop.f32.mrb[0].mxu1 }
  0xf2   : > { %v3992_v17 = vpop.f32.mrb[1].mxu1 }
  0xf3   : > { %v400_v18 = vpop.f32.mrb[2].mxu1  ;;  %v324_v19 = vpop.f32.mrb[0].mxu0 }
  0xf4   : > { %v478_v20 = vpack.c.bf16 %v400_v18, %v397_v16  ;;  %v3993_v21 = vpop.f32.mrb[3].mxu1  ;;  %v3980_v22 = vpop.f32.mrb[1].mxu0 }
  0xf5   : > { %v327_v23 = vpop.f32.mrb[2].mxu0 }
  0xf6   : > { %v484_v24 = vsel %vm479_vm2, %v478_v20, 0  ;;  %v477_v25 = vpack.c.bf16 %v327_v23, %v324_v19  ;;  %v3981_v26 = vpop.f32.mrb[3].mxu0 }
  0xf7   : > { %4007 = vmatpush3.bf16.xpose.msra.mxu1 %v484_v24 }
  0xf8   : > { %4012 = vmatprep.subr.bf16.mxu1 %v4669_v1 }
  0xfe   : > { %4009 = vmatmul.mubr.msk.bf16.vlgmr.msra.gmra.mrb[4].mxu1 %vm479_vm2, %v477_v25 }
  0xff   : > { %4014 = vmatprep.mubr.msk.bf16.mxu1 %vm4670_vm0, %v4669_v1 }
 0x103   : > { %v470_v33 = vpop.f32.mrb[4].mxu0 }
 0x104   : > { %v4004_v34 = vpop.f32.mrb[5].mxu0 }
 0x105   : > { %v473_v35 = vpop.f32.mrb[6].mxu0 }
 0x106   : > { %v547_v36 = vpack.c.bf16 %v473_v35, %v470_v33  ;;  %v4005_v37 = vpop.f32.mrb[7].mxu0  ;;  %v597_v35 = vld [vmem:[%s5507_s4] sm:$0xf] }
 0x107   : > { %v992_v41 = vsel %vm943_vm4, %v597_v35, 0 }
 0x108   : > { %4013 = vmatpush3.bf16.msra.mxu1 %v547_v36 }
 0x109   : > { %4030 = vmatprep.subr.bf16.mxu1 %v4669_v1 }
 0x113   : > { %v665_v56 = vpop.f32.mrb[8].mxu0 }
 0x114   : > { %v4028_v57 = vpop.f32.mrb[9].mxu0 }
 0x115   : > { %v668_v58 = vpop.f32.mrb[10].mxu0 }
 0x116   : > { %v820_v59 = vpack.c.bf16 %v668_v58, %v665_v56  ;;  %v4029_v60 = vpop.f32.mrb[11].mxu0 }
 0x123   : > { %v813_v20 = vpop.f32.mrb[12].mxu0 }
 0x124   : > { %v4052_v21 = vpop.f32.mrb[13].mxu0 }
 0x125   : > { %v816_v22 = vpop.f32.mrb[14].mxu0 }
 0x126   : > { %v4053_v23 = vpop.f32.mrb[15].mxu0  ;;  %v888_v24 = vpack.c.bf16 %v816_v22, %v813_v20 }
 0x1d1   : > { %v520_v27 = vpop.f32.mrb[4].mxu1 }
 0x1d2   : > { %v4010_v28 = vpop.f32.mrb[5].mxu1  ;;  %v528_v29 = vsel %vm527_vm3, %v520_v27, -inf }
 0x1d3   : > { %529 = vmax.xlane.f32.xlu0 %v528_v29  ;;  %v523_v30 = vpop.f32.mrb[6].mxu1 }
 0x1d4   : > { %v4011_v31 = vpop.f32.mrb[7].mxu1  ;;  %v531_v32 = vsel %vm527_vm3, %v523_v30, -inf }
 0x1d7   : > { %532 = vmax.xlane.f32.xlu0 %v531_v32 }
 0x260   : > { %v530_v42 = vpop.xlane.xlu0 %529 }
 0x261   : > { %v534_v43 = vsub.f32 %v520_v27, %v530_v42 }
 0x263   : > { %v536_v44 = vmul.f32 1.442695, %v534_v43 }
 0x264   : > { %v533_v45 = vpop.xlane.xlu0 %532 }
 0x265   : > { %4541 = vpow2.f32 %v536_v44  ;;  %v535_v46 = vsub.f32 %v523_v30, %v533_v45  ;;  %v4469_v45 = vld [vmem:[%s5505_s2 + $0x40] sm:$0xff]  }
 0x267   : > { %v538_v47 = vmul.f32 1.442695, %v535_v46  ;;  %v4470_v46 = vld [vmem:[%s5505_s2 + $0x48] sm:$0xff]  }
 0x269   : > { %4543 = vpow2.f32 %v538_v47  ;;  %v3533_v47 = vld [vmem:[%s5507_s4 + $0x4] sm:$0xf] }
 0x26f   : > { %v4542_v48 = vpop.eup %4541 }
 0x270   : > { %v540_v49 = vsel %vm527_vm3, %v4542_v48, 0.0 }
 0x271   : > { %541 = vadd.xlane.f32.xlu0 %v540_v49  ;;  %v4471_v49 = vld [vmem:[%s5505_s2 + $0x50] sm:$0xff]  }
 0x273   : > { %v4544_v50 = vpop.eup %4543 }
 0x274   : > { %v546_v52 = vpack.c.bf16 %v4544_v50, %v4542_v48  ;;  %v543_v19 = vsel %vm527_vm3, %v4544_v50, 0.0  ;;  %v945_v48 = vsel %vm943_vm4, %v3533_v47, 0  ;;  %v4473_v50 = vld [vmem:[%s5505_s2 + $0x58] sm:$0xff]  }
 0x275   : > { %4067 = vmatpush3.bf16.msra.mxu0 %v945_v48 }
 0x276   : > { %4015 = vmatmul.mubr.msk.bf16.vlgmr.msra.gmra.mrb[8].mxu1 %vm527_vm3, %v546_v52  ;;  %4078 = vmatprep.subr.bf16.mxu0 %v4669_v1 }
 0x277   : > { %4031 = vmatpush3.bf16.msra.mxu1 %v4457_v51  ;;  %4038 = vmatprep.mubr.msk.bf16.mxu1 %vm4670_vm0, %v4669_v1 }
 0x278   : > { %4032 = vmatprep.subr.bf16.mxu1 %v4669_v1 }
 0x27b   : > { %4033 = vmatpush3.bf16.msra.mxu1 %v4458_v53 }
 0x27c   : > { %4034 = vmatprep.subr.bf16.mxu1 %v4669_v1 }
 0x27f   : > { %4035 = vmatpush3.bf16.msra.mxu1 %v4460_v54 }
 0x280   : > { %4036 = vmatprep.subr.bf16.mxu1 %v4669_v1 }
 0x283   : > { %4037 = vmatpush3.bf16.msra.mxu1 %v4462_v55 }
 0x284   : > { %4054 = vmatprep.subr.bf16.mxu1 %v4669_v1 }
 0x286   : > { %4039 = vmatmul.mubr.msk.bf16.vlgmr.msra.gmra.mrb[12].mxu1 %vm286_vm1, %v4797_v11 }
 0x287   : > { %4056 = vmatprep.mubr.msk.bf16.mxu1 %vm4670_vm0, %v4669_v1 }
 0x2fe   : > { %v542_v29 = vpop.xlane.xlu0 %541 }
 0x349   : > { %v585_v2 = vpop.f32.mrb[8].mxu1 }
 0x34a   : > { %v4016_v3 = vpop.f32.mrb[9].mxu1 }
 0x34b   : > { %v588_v4 = vpop.f32.mrb[10].mxu1 }
 0x34c   : > { %v4017_v5 = vpop.f32.mrb[11].mxu1 }
 0x34d   : > { %v4475_v5 = vld [vmem:[%s5504_s1 + $0x50] sm:$0xff]  }
 0x359   : > { %v739_v6 = vpop.f32.mrb[12].mxu1 }
 0x35a   : > { %v4040_v7 = vpop.f32.mrb[13].mxu1 }
 0x35b   : > { %v742_v8 = vpop.f32.mrb[14].mxu1 }
 0x35c   : > { %v821_v9 = vpack.c.bf16 %v742_v8, %v739_v6  ;;  %v4041_v10 = vpop.f32.mrb[15].mxu1  ;;  %v4476_v6 = vld [vmem:[%s5504_s1 + $0x58] sm:$0xff]  }
 0x35e   : > { %v826_v12 = vsel %vm479_vm2, %v821_v9, 0 }
 0x35f   : > { %4055 = vmatpush3.bf16.xpose.msra.mxu1 %v826_v12 }
 0x360   : > { %4060 = vmatprep.subr.bf16.mxu1 %v4669_v1 }
 0x366   : > { %4057 = vmatmul.mubr.msk.bf16.vlgmr.msra.gmra.mrb[16].mxu1 %vm479_vm2, %v820_v59 }
 0x367   : > { %4062 = vmatprep.mubr.msk.bf16.mxu1 %vm4670_vm0, %v4669_v1  ;;  %4061 = vmatpush3.bf16.msra.mxu1 %v888_v24 }
 0x368   : > { %4072 = vmatprep.subr.bf16.mxu1 %v4669_v1 }
 0x439   : > { %v862_v13 = vpop.f32.mrb[16].mxu1 }
 0x43a   : > { %v4058_v14 = vpop.f32.mrb[17].mxu1  ;;  %v869_v15 = vsel %vm527_vm3, %v862_v13, -inf }
 0x43b   : > { %870 = vmax.xlane.f32.xlu1 %v869_v15  ;;  %v865_v16 = vpop.f32.mrb[18].mxu1  ;;  %v4477_v14 = vld [vmem:[%s5506_s3 + $0x40] sm:$0xff]   ;;  %v4478_v15 = vld [vmem:[%s5506_s3 + $0x48] sm:$0xff]  }
 0x43c   : > { %v4059_v17 = vpop.f32.mrb[19].mxu1  ;;  %v872_v18 = vsel %vm527_vm3, %v865_v16, -inf }
 0x43d   : > { %v4480_v17 = vld [vmem:[%s5506_s3 + $0x58] sm:$0xff]  }
 0x43f   : > { %873 = vmax.xlane.f32.xlu1 %v872_v18 }
 0x443   : > { %544 = vadd.xlane.f32.xlu1 %v543_v19 }
 0x4c8   : > { %v871_v25 = vpop.xlane.xlu1 %870 }
 0x4c9   : > { %v875_v26 = vsub.f32 %v862_v13, %v871_v25 }
 0x4cb   : > { %v877_v27 = vmul.f32 1.442695, %v875_v26 }
 0x4cc   : > { %v874_v28 = vpop.xlane.xlu1 %873 }
 0x4cd   : > { %4545 = vpow2.f32 %v877_v27  ;;  %v876_v30 = vsub.f32 %v865_v16, %v874_v28  ;;  %v4479_v16 = vld [vmem:[%s5506_s3 + $0x50] sm:$0xff]  }
 0x4ce   : > { %4547 = vrcp.f32 %v542_v29 }
 0x4cf   : > { %v879_v31 = vmul.f32 1.442695, %v876_v30 }
 0x4d0   : > { %v545_v32 = vpop.xlane.xlu1 %544 }
 0x4d1   : > { %4549 = vpow2.f32 %v879_v31 }
 0x4d2   : > { %4551 = vrcp.f32 %v545_v32 }
 0x4d7   : > { %v4546_v33 = vpop.eup %4545 }
 0x4d8   : > { %v881_v34 = vsel %vm527_vm3, %v4546_v33, 0.0  ;;  %v4548_v36 = vpop.eup %4547 }
 0x4d9   : > { %882 = vadd.xlane.f32.xlu0 %v881_v34  ;;  %v594_v42 = vmul.f32 %v4548_v36, %v585_v2 }
 0x4db   : > { %v4550_v37 = vpop.eup %4549 }
 0x4dc   : > { %v4552_v38 = vpop.eup %4551  ;;  %v884_v39 = vsel %vm527_vm3, %v4550_v37, 0.0  ;;  %v887_v40 = vpack.c.bf16 %v4550_v37, %v4546_v33 }
 0x4dd   : > { %v595_v43 = vmul.f32 %v4552_v38, %v588_v4  ;;  %885 = vadd.xlane.f32.xlu1 %v884_v39 }
 0x4de   : > { %4063 = vmatmul.mubr.msk.bf16.vlgmr.msra.gmra.mrb[20].mxu1 %vm527_vm3, %v887_v40 }
 0x4df   : > { %4073 = vmatpush3.bf16.msra.mxu1 %v992_v41  ;;  %4074 = vmatprep.mubr.msk.bf16.mxu1 %vm4670_vm0, %v4669_v1  ;;  %v596_v44 = vpack.c.bf16 %v595_v43, %v594_v42 }
 0x4e0   : > { %4090 = vmatprep.subr.bf16.mxu1 %v4669_v1 }
 0x4e6   : > { %4075 = vmatmul.mubr.msk.bf16.vlgmr.msra.gmra.mrb[24].mxu1 %vm479_vm2, %v596_v44 }
 0x4e7   : > { %4098 = vmatprep.mubr.msk.bf16.mxu1 %vm4670_vm0, %v4669_v1  ;;  %4091 = vmatpush3.bf16.msra.mxu1 %v4469_v45 }
 0x4e8   : > { %4092 = vmatprep.subr.bf16.mxu1 %v4669_v1 }
 0x4eb   : > { %4093 = vmatpush3.bf16.msra.mxu1 %v4470_v46 }
 0x4ec   : > { %4094 = vmatprep.subr.bf16.mxu1 %v4669_v1 }
 0x4ef   : > { %4095 = vmatpush3.bf16.msra.mxu1 %v4471_v49 }
 0x4f0   : > { %4096 = vmatprep.subr.bf16.mxu1 %v4669_v1 }
 0x4f3   : > { %4097 = vmatpush3.bf16.msra.mxu1 %v4473_v50 }
 0x4f4   : > { %4114 = vmatprep.subr.bf16.mxu1 %v4669_v1 }
 0x4f6   : > { %4099 = vmatmul.mubr.msk.bf16.vlgmr.msra.gmra.mrb[28].mxu1 %vm286_vm1, %v4797_v11 }
 0x4f7   : > { %4116 = vmatprep.mubr.msk.bf16.mxu1 %vm4670_vm0, %v4669_v1 }
 0x566   : > { %v883_v51 = vpop.xlane.xlu0 %882 }
 0x567   : > { %4553 = vrcp.f32 %v883_v51  ;;  %v3577_v51 = vld [vmem:[%s5507_s4 + $0x8] sm:$0xf] }
 0x56a   : > { %v886_v52 = vpop.xlane.xlu1 %885 }
 0x56b   : > { %4555 = vrcp.f32 %v886_v52  ;;  %v1381_v52 = vsel %vm943_vm4, %v3577_v51, 0 }
 0x571   : > { %v4554_v54 = vpop.eup %4553 }
 0x575   : > { %v4556_v56 = vpop.eup %4555 }
 0x5b1   : > { %v926_v53 = vpop.f32.mrb[20].mxu1 }
 0x5b2   : > { %v4064_v55 = vpop.f32.mrb[21].mxu1  ;;  %v935_v58 = vmul.f32 %v4554_v54, %v926_v53  ;;  %v4483_v53 = vld [vmem:[%s5504_s1 + $0x60] sm:$0xff]   ;;  %v4485_v54 = vld [vmem:[%s5504_s1 + $0x68] sm:$0xff]  }
 0x5b3   : > { %v929_v57 = vpop.f32.mrb[22].mxu1  ;;  %v4487_v55 = vld [vmem:[%s5504_s1 + $0x70] sm:$0xff]  }
 0x5b4   : > { %v936_v59 = vmul.f32 %v4556_v56, %v929_v57  ;;  %v4065_v60 = vpop.f32.mrb[23].mxu1  ;;  %v4488_v56 = vld [vmem:[%s5504_s1 + $0x78] sm:$0xff]  }
 0x5b6   : > { %v937_v62 = vpack.c.bf16 %v936_v59, %v935_v58 }
 0x5b8   : > { %4069 = vmatmul.mubr.msk.bf16.vlgmr.msra.gmra.mrb[16].mxu0 %vm479_vm2, %v937_v62 }
 0x5b9   : > { %4079 = vmatpush3.bf16.msra.mxu0 %v4472_v61  ;;  %v1028_v63 = vpop.f32.mrb[24].mxu1  ;;  %4086 = vmatprep.mubr.msk.bf16.mxu0 %vm4670_vm0, %v4669_v1 }
 0x5ba   : > { %v4076_v2 = vpop.f32.mrb[25].mxu1  ;;  %4080 = vmatprep.subr.bf16.mxu0 %v4669_v1 }
 0x5bb   : > { %v1031_v3 = vpop.f32.mrb[26].mxu1 }
 0x5bc   : > { %v4077_v4 = vpop.f32.mrb[27].mxu1 }
 0x5bd   : > { %4081 = vmatpush3.bf16.msra.mxu0 %v4474_v0  ;;  %v4481_v4 = vld [vmem:[%s5505_s2 + $0x60] sm:$0xff]  }
 0x5be   : > { %4082 = vmatprep.subr.bf16.mxu0 %v4669_v1 }
 0x5c1   : > { %4083 = vmatpush3.bf16.msra.mxu0 %v4475_v5 }
 0x5c2   : > { %4084 = vmatprep.subr.bf16.mxu0 %v4669_v1 }
 0x5c5   : > { %4085 = vmatpush3.bf16.msra.mxu0 %v4476_v6  ;;  %v4482_v6 = vld [vmem:[%s5505_s2 + $0x68] sm:$0xff]  }
 0x5c6   : > { %4102 = vmatprep.subr.bf16.mxu0 %v4669_v1 }
 0x5c8   : > { %4087 = vmatmul.mubr.msk.bf16.vlgmr.msra.gmra.mrb[20].mxu0 %vm286_vm1, %v4797_v11 }
 0x5c9   : > { %4110 = vmatprep.mubr.msk.bf16.mxu0 %vm4670_vm0, %v4669_v1  ;;  %v1176_v7 = vpop.f32.mrb[28].mxu1  ;;  %4103 = vmatpush3.bf16.msra.mxu0 %v4477_v14 }
 0x5ca   : > { %v4100_v8 = vpop.f32.mrb[29].mxu1  ;;  %4104 = vmatprep.subr.bf16.mxu0 %v4669_v1 }
 0x5cb   : > { %v1179_v9 = vpop.f32.mrb[30].mxu1  ;;  %v4486_v8 = vld [vmem:[%s5505_s2 + $0x78] sm:$0xff]  }
 0x5cc   : > { %v1258_v10 = vpack.c.bf16 %v1179_v9, %v1176_v7  ;;  %v4101_v12 = vpop.f32.mrb[31].mxu1  ;;  %v4484_v7 = vld [vmem:[%s5505_s2 + $0x70] sm:$0xff]  }
 0x5cd   : > { %4105 = vmatpush3.bf16.msra.mxu0 %v4478_v15  ;;  %v4489_v15 = vld [vmem:[%s5506_s3 + $0x60] sm:$0xff]  }
 0x5ce   : > { %v1263_v13 = vsel %vm479_vm2, %v1258_v10, 0  ;;  %4106 = vmatprep.subr.bf16.mxu0 %v4669_v1 }
 0x5cf   : > { %4115 = vmatpush3.bf16.xpose.msra.mxu1 %v1263_v13 }
 0x5d0   : > { %4120 = vmatprep.subr.bf16.mxu1 %v4669_v1 }
 0x5d1   : > { %4107 = vmatpush3.bf16.msra.mxu0 %v4479_v16  ;;  %v4490_v16 = vld [vmem:[%s5506_s3 + $0x68] sm:$0xff]  }
 0x5d2   : > { %4108 = vmatprep.subr.bf16.mxu0 %v4669_v1 }
 0x5d5   : > { %4109 = vmatpush3.bf16.msra.mxu0 %v4480_v17  ;;  %v4491_v17 = vld [vmem:[%s5506_s3 + $0x70] sm:$0xff]  }
 0x5d6   : > { %4126 = vmatprep.subr.bf16.mxu0 %v4669_v1 }
 0x5d8   : > { %4111 = vmatmul.mubr.msk.bf16.vlgmr.msra.gmra.mrb[24].mxu0 %vm286_vm1, %v4797_v11 }
 0x5d9   : > { %4128 = vmatprep.mubr.msk.bf16.mxu0 %vm4670_vm0, %v4669_v1  ;;  %4127 = vmatpush3.bf16.msra.mxu0 %v1381_v52 }
 0x5da   : > { %4144 = vmatprep.subr.bf16.mxu0 %v4669_v1 }
 0x68b   : > { %v981_v18 = vpop.f32.mrb[16].mxu0 }
 0x68c   : > { %v4994_v19 = vadd.f32 %v1028_v63, %v981_v18  ;;  %v4070_v20 = vpop.f32.mrb[17].mxu0  ;;  %v4492_v18 = vld [vmem:[%s5506_s3 + $0x78] sm:$0xff]  }
 0x68d   : > { %v984_v21 = vpop.f32.mrb[18].mxu0 }
 0x68e   : > { %v4996_v22 = vadd.f32 %v1031_v3, %v984_v21  ;;  %v4071_v23 = vpop.f32.mrb[19].mxu0 }
 0x69b   : > { %v1102_v24 = vpop.f32.mrb[20].mxu0 }
 0x69c   : > { %v4088_v25 = vpop.f32.mrb[21].mxu0 }
 0x69d   : > { %v1105_v26 = vpop.f32.mrb[22].mxu0 }
 0x69e   : > { %v1257_v27 = vpack.c.bf16 %v1105_v26, %v1102_v24  ;;  %v4089_v28 = vpop.f32.mrb[23].mxu0 }
 0x6a0   : > { %4117 = vmatmul.mubr.msk.bf16.vlgmr.msra.gmra.mrb[32].mxu1 %vm479_vm2, %v1257_v27 }
 0x6a1   : > { %4122 = vmatprep.mubr.msk.bf16.mxu1 %vm4670_vm0, %v4669_v1 }
 0x6ab   : > { %v1250_v35 = vpop.f32.mrb[24].mxu0 }
 0x6ac   : > { %v4112_v36 = vpop.f32.mrb[25].mxu0 }
 0x6ad   : > { %v1253_v37 = vpop.f32.mrb[26].mxu0 }
 0x6ae   : > { %v1325_v38 = vpack.c.bf16 %v1253_v37, %v1250_v35  ;;  %v4113_v39 = vpop.f32.mrb[27].mxu0 }
 0x6b0   : > { %4121 = vmatpush3.bf16.msra.mxu1 %v1325_v38 }
 0x6b1   : > { %4132 = vmatprep.subr.bf16.mxu1 %v4669_v1 }
 0x773   : > { %v1299_v29 = vpop.f32.mrb[32].mxu1 }
 0x774   : > { %v4118_v30 = vpop.f32.mrb[33].mxu1  ;;  %v1306_v31 = vsel %vm527_vm3, %v1299_v29, -inf }
 0x775   : > { %1307 = vmax.xlane.f32.xlu0 %v1306_v31  ;;  %v1302_v32 = vpop.f32.mrb[34].mxu1 }
 0x776   : > { %v4119_v33 = vpop.f32.mrb[35].mxu1  ;;  %v1309_v34 = vsel %vm527_vm3, %v1302_v32, -inf }
 0x777   : > { %1310 = vmax.xlane.f32.xlu1 %v1309_v34 }
 0x802   : > { %v1308_v40 = vpop.xlane.xlu0 %1307 }
 0x803   : > { %v1312_v41 = vsub.f32 %v1299_v29, %v1308_v40 }
 0x804   : > { %v1311_v42 = vpop.xlane.xlu1 %1310 }
 0x805   : > { %v1314_v43 = vmul.f32 1.442695, %v1312_v41  ;;  %v1313_v44 = vsub.f32 %v1302_v32, %v1311_v42 }
 0x807   : > { %4557 = vpow2.f32 %v1314_v43  ;;  %v1316_v45 = vmul.f32 1.442695, %v1313_v44 }
 0x809   : > { %4559 = vpow2.f32 %v1316_v45 }
 0x811   : > { %v4558_v46 = vpop.eup %4557 }
 0x812   : > { %v1318_v47 = vsel %vm527_vm3, %v4558_v46, 0.0 }
 0x813   : > { %v4560_v48 = vpop.eup %4559  ;;  %1319 = vadd.xlane.f32.xlu0 %v1318_v47 }
 0x814   : > { %v1321_v49 = vsel %vm527_vm3, %v4560_v48, 0.0  ;;  %v1324_v50 = vpack.c.bf16 %v4560_v48, %v4558_v46 }
 0x815   : > { %1322 = vadd.xlane.f32.xlu1 %v1321_v49 }
 0x816   : > { %4123 = vmatmul.mubr.msk.bf16.vlgmr.msra.gmra.mrb[36].mxu1 %vm527_vm3, %v1324_v50 }
 0x817   : > { %4140 = vmatprep.mubr.msk.bf16.mxu1 %vm4670_vm0, %v4669_v1  ;;  %4133 = vmatpush3.bf16.msra.mxu1 %v4483_v53  ;;  %v3620_v53 = vld [vmem:[%s5507_s4 + $0xc] sm:$0xf] }
 0x818   : > { %4134 = vmatprep.subr.bf16.mxu1 %v4669_v1 }
 0x81b   : > { %4135 = vmatpush3.bf16.msra.mxu1 %v4485_v54  ;;  %v1772_v54 = vsel %vm943_vm4, %v3620_v53, 0 }
 0x81c   : > { %4136 = vmatprep.subr.bf16.mxu1 %v4669_v1 }
 0x81f   : > { %4137 = vmatpush3.bf16.msra.mxu1 %v4487_v55  ;;  %v4495_v55 = vld [vmem:[%s5504_s1 + $0x80] sm:$0xff]  }
 0x820   : > { %4138 = vmatprep.subr.bf16.mxu1 %v4669_v1 }
 0x823   : > { %4139 = vmatpush3.bf16.msra.mxu1 %v4488_v56  ;;  %v4497_v56 = vld [vmem:[%s5504_s1 + $0x88] sm:$0xff]  }
 0x824   : > { %4156 = vmatprep.subr.bf16.mxu1 %v4669_v1 }
 0x826   : > { %4141 = vmatmul.mubr.msk.bf16.vlgmr.msra.gmra.mrb[40].mxu1 %vm286_vm1, %v4797_v11 }
 0x827   : > { %4164 = vmatprep.mubr.msk.bf16.mxu1 %vm4670_vm0, %v4669_v1  ;;  %4157 = vmatpush3.bf16.msra.mxu1 %v4489_v15 }
 0x828   : > { %4158 = vmatprep.subr.bf16.mxu1 %v4669_v1 }
 0x82b   : > { %4159 = vmatpush3.bf16.msra.mxu1 %v4490_v16 }
 0x82c   : > { %4160 = vmatprep.subr.bf16.mxu1 %v4669_v1 }
 0x82f   : > { %4161 = vmatpush3.bf16.msra.mxu1 %v4491_v17  ;;  %v4501_v17 = vld [vmem:[%s5506_s3 + $0x80] sm:$0xff]  }
 0x830   : > { %4162 = vmatprep.subr.bf16.mxu1 %v4669_v1 }
 0x833   : > { %4163 = vmatpush3.bf16.msra.mxu1 %v4492_v18  ;;  %v4502_v18 = vld [vmem:[%s5506_s3 + $0x88] sm:$0xff]  }
 0x834   : > { %4180 = vmatprep.subr.bf16.mxu1 %v4669_v1 }
 0x836   : > { %4165 = vmatmul.mubr.msk.bf16.vlgmr.msra.gmra.mrb[44].mxu1 %vm286_vm1, %v4797_v11 }
 0x837   : > { %4182 = vmatprep.mubr.msk.bf16.mxu1 %vm4670_vm0, %v4669_v1  ;;  %4181 = vmatpush3.bf16.msra.mxu1 %v1772_v54 }
 0x838   : > { %4198 = vmatprep.subr.bf16.mxu1 %v4669_v1 }
 0x8a0   : > { %v1320_v57 = vpop.xlane.xlu0 %1319 }
 0x8a1   : > { %4561 = vrcp.f32 %v1320_v57  ;;  %v4499_v57 = vld [vmem:[%s5504_s1 + $0x90] sm:$0xff]  }
 0x8a2   : > { %v1323_v58 = vpop.xlane.xlu1 %1322 }
 0x8a3   : > { %4563 = vrcp.f32 %v1323_v58  ;;  %v4500_v58 = vld [vmem:[%s5504_s1 + $0x98] sm:$0xff]  }
 0x8ab   : > { %v4562_v60 = vpop.eup %4561 }
 0x8ad   : > { %v4564_v62 = vpop.eup %4563 }
 0x8e9   : > { %v1363_v59 = vpop.f32.mrb[36].mxu1 }
 0x8ea   : > { %v4124_v61 = vpop.f32.mrb[37].mxu1  ;;  %v1372_v0 = vmul.f32 %v4562_v60, %v1363_v59 }
 0x8eb   : > { %v1366_v63 = vpop.f32.mrb[38].mxu1 }
 0x8ec   : > { %v1373_v2 = vmul.f32 %v4564_v62, %v1366_v63  ;;  %v4125_v3 = vpop.f32.mrb[39].mxu1 }
 0x8ee   : > { %v1374_v5 = vpack.c.bf16 %v1373_v2, %v1372_v0 }
 0x8f0   : > { %4129 = vmatmul.mubr.msk.bf16.vlgmr.msra.gmra.mrb[28].mxu0 %vm479_vm2, %v1374_v5 }
 0x8f1   : > { %4145 = vmatpush3.bf16.msra.mxu0 %v4481_v4  ;;  %4152 = vmatprep.mubr.msk.bf16.mxu0 %vm4670_vm0, %v4669_v1 }
 0x8f2   : > { %4146 = vmatprep.subr.bf16.mxu0 %v4669_v1 }
 0x8f5   : > { %4147 = vmatpush3.bf16.msra.mxu0 %v4482_v6  ;;  %v4493_v6 = vld [vmem:[%s5505_s2 + $0x80] sm:$0xff]  }
 0x8f6   : > { %4148 = vmatprep.subr.bf16.mxu0 %v4669_v1 }
 0x8f9   : > { %4149 = vmatpush3.bf16.msra.mxu0 %v4484_v7  ;;  %v1493_v9 = vpop.f32.mrb[40].mxu1 }
 0x8fa   : > { %4150 = vmatprep.subr.bf16.mxu0 %v4669_v1  ;;  %v4142_v10 = vpop.f32.mrb[41].mxu1 }
 0x8fb   : > { %v1496_v12 = vpop.f32.mrb[42].mxu1  ;;  %v4498_v10 = vld [vmem:[%s5505_s2 + $0x98] sm:$0xff]  }
 0x8fc   : > { %v1648_v13 = vpack.c.bf16 %v1496_v12, %v1493_v9  ;;  %v4143_v14 = vpop.f32.mrb[43].mxu1  ;;  %v4496_v9 = vld [vmem:[%s5505_s2 + $0x90] sm:$0xff]  }
 0x8fd   : > { %4151 = vmatpush3.bf16.msra.mxu0 %v4486_v8  ;;  %v4494_v8 = vld [vmem:[%s5505_s2 + $0x88] sm:$0xff]  }
 0x8fe   : > { %4168 = vmatprep.subr.bf16.mxu0 %v4669_v1 }
 0x900   : > { %4153 = vmatmul.mubr.msk.bf16.vlgmr.msra.gmra.mrb[32].mxu0 %vm286_vm1, %v4797_v11 }
 0x901   : > { %4170 = vmatprep.mubr.msk.bf16.mxu0 %vm4670_vm0, %v4669_v1 }
 0x909   : > { %v1641_v37 = vpop.f32.mrb[44].mxu1 }
 0x90a   : > { %v4166_v38 = vpop.f32.mrb[45].mxu1 }
 0x90b   : > { %v1644_v39 = vpop.f32.mrb[46].mxu1 }
 0x90c   : > { %v1716_v40 = vpack.c.bf16 %v1644_v39, %v1641_v37  ;;  %v4167_v41 = vpop.f32.mrb[47].mxu1 }
 0x9c3   : > { %v1417_v20 = vpop.f32.mrb[28].mxu0 }
 0x9c4   : > { %v5078_v21 = vadd.f32 %v1417_v20, %v4994_v19  ;;  %v4130_v23 = vpop.f32.mrb[29].mxu0  ;;  %v4503_v20 = vld [vmem:[%s5506_s3 + $0x90] sm:$0xff]  }
 0x9c5   : > { %v1420_v24 = vpop.f32.mrb[30].mxu0  ;;  %v4504_v23 = vld [vmem:[%s5506_s3 + $0x98] sm:$0xff]  }
 0x9c6   : > { %v5081_v25 = vadd.f32 %v1420_v24, %v4996_v22  ;;  %v4131_v26 = vpop.f32.mrb[31].mxu0 }
 0x9d3   : > { %v1567_v27 = vpop.f32.mrb[32].mxu0 }
 0x9d4   : > { %v4154_v28 = vpop.f32.mrb[33].mxu0 }
 0x9d5   : > { %v1570_v29 = vpop.f32.mrb[34].mxu0 }
 0x9d6   : > { %v1649_v30 = vpack.c.bf16 %v1570_v29, %v1567_v27  ;;  %v4155_v31 = vpop.f32.mrb[35].mxu0 }
 0x9d8   : > { %v1654_v32 = vsel %vm479_vm2, %v1649_v30, 0 }
 0x9d9   : > { %4169 = vmatpush3.bf16.xpose.msra.mxu0 %v1654_v32 }
 0x9da   : > { %4174 = vmatprep.subr.bf16.mxu0 %v4669_v1 }
 0x9e0   : > { %4171 = vmatmul.mubr.msk.bf16.vlgmr.msra.gmra.mrb[36].mxu0 %vm479_vm2, %v1648_v13 }
 0x9e1   : > { %4176 = vmatprep.mubr.msk.bf16.mxu0 %vm4670_vm0, %v4669_v1  ;;  %4175 = vmatpush3.bf16.msra.mxu0 %v1716_v40 }
 0x9e2   : > { %4186 = vmatprep.subr.bf16.mxu0 %v4669_v1 }
 0xab3   : > { %v1690_v19 = vpop.f32.mrb[36].mxu0 }
 0xab4   : > { %v4172_v33 = vpop.f32.mrb[37].mxu0  ;;  %v1697_v22 = vsel %vm527_vm3, %v1690_v19, -inf }
 0xab5   : > { %1698 = vmax.xlane.f32.xlu0 %v1697_v22  ;;  %v1693_v34 = vpop.f32.mrb[38].mxu0 }
 0xab6   : > { %v4173_v35 = vpop.f32.mrb[39].mxu0  ;;  %v1700_v36 = vsel %vm527_vm3, %v1693_v34, -inf }
 0xab7   : > { %1701 = vmax.xlane.f32.xlu1 %v1700_v36 }
 0xb42   : > { %v1699_v42 = vpop.xlane.xlu0 %1698 }
 0xb43   : > { %v1703_v43 = vsub.f32 %v1690_v19, %v1699_v42 }
 0xb44   : > { %v1702_v44 = vpop.xlane.xlu1 %1701 }
 0xb45   : > { %v1705_v45 = vmul.f32 1.442695, %v1703_v43  ;;  %v1704_v46 = vsub.f32 %v1693_v34, %v1702_v44 }
 0xb47   : > { %4565 = vpow2.f32 %v1705_v45  ;;  %v1707_v47 = vmul.f32 1.442695, %v1704_v46 }
 0xb49   : > { %4567 = vpow2.f32 %v1707_v47 }
 0xb51   : > { %v4566_v48 = vpop.eup %4565 }
 0xb52   : > { %v1709_v49 = vsel %vm527_vm3, %v4566_v48, 0.0 }
 0xb53   : > { %v4568_v50 = vpop.eup %4567  ;;  %1710 = vadd.xlane.f32.xlu0 %v1709_v49 }
 0xb54   : > { %v1712_v51 = vsel %vm527_vm3, %v4568_v50, 0.0  ;;  %v1715_v52 = vpack.c.bf16 %v4568_v50, %v4566_v48 }
 0xb55   : > { %1713 = vadd.xlane.f32.xlu1 %v1712_v51 }
 0xb56   : > { %4177 = vmatmul.mubr.msk.bf16.vlgmr.msra.gmra.mrb[40].mxu0 %vm527_vm3, %v1715_v52 }
 0xb57   : > { %4194 = vmatprep.mubr.msk.bf16.mxu0 %vm4670_vm0, %v4669_v1  ;;  %4187 = vmatpush3.bf16.msra.mxu0 %v4495_v55  ;;  %v3663_v55 = vld [vmem:[%s5507_s4 + $0x10] sm:$0xf] }
 0xb58   : > { %4188 = vmatprep.subr.bf16.mxu0 %v4669_v1 }
 0xb5b   : > { %4189 = vmatpush3.bf16.msra.mxu0 %v4497_v56  ;;  %v2163_v56 = vsel %vm943_vm4, %v3663_v55, 0 }
 0xb5c   : > { %4190 = vmatprep.subr.bf16.mxu0 %v4669_v1 }
 0xb5f   : > { %4191 = vmatpush3.bf16.msra.mxu0 %v4499_v57  ;;  %v4507_v57 = vld [vmem:[%s5504_s1 + $0xa0] sm:$0xff]  }
 0xb60   : > { %4192 = vmatprep.subr.bf16.mxu0 %v4669_v1 }
 0xb63   : > { %4193 = vmatpush3.bf16.msra.mxu0 %v4500_v58  ;;  %v4509_v58 = vld [vmem:[%s5504_s1 + $0xa8] sm:$0xff]  }
 0xb64   : > { %4210 = vmatprep.subr.bf16.mxu0 %v4669_v1 }
 0xb66   : > { %4195 = vmatmul.mubr.msk.bf16.vlgmr.msra.gmra.mrb[44].mxu0 %vm286_vm1, %v4797_v11 }
 0xb67   : > { %4218 = vmatprep.mubr.msk.bf16.mxu0 %vm4670_vm0, %v4669_v1  ;;  %4211 = vmatpush3.bf16.msra.mxu0 %v4501_v17 }
 0xb68   : > { %4212 = vmatprep.subr.bf16.mxu0 %v4669_v1 }
 0xb6b   : > { %4213 = vmatpush3.bf16.msra.mxu0 %v4502_v18 }
 0xb6c   : > { %4214 = vmatprep.subr.bf16.mxu0 %v4669_v1 }
 0xb6f   : > { %4215 = vmatpush3.bf16.msra.mxu0 %v4503_v20  ;;  %v4513_v20 = vld [vmem:[%s5506_s3 + $0xa0] sm:$0xff]  }
 0xb70   : > { %4216 = vmatprep.subr.bf16.mxu0 %v4669_v1 }
 0xb73   : > { %4217 = vmatpush3.bf16.msra.mxu0 %v4504_v23  ;;  %v4514_v23 = vld [vmem:[%s5506_s3 + $0xa8] sm:$0xff]  }
 0xb74   : > { %4234 = vmatprep.subr.bf16.mxu0 %v4669_v1 }
 0xb76   : > { %4219 = vmatmul.mubr.msk.bf16.vlgmr.msra.gmra.mrb[48].mxu0 %vm286_vm1, %v4797_v11 }
 0xb77   : > { %4236 = vmatprep.mubr.msk.bf16.mxu0 %vm4670_vm0, %v4669_v1  ;;  %4235 = vmatpush3.bf16.msra.mxu0 %v2163_v56 }
 0xb78   : > { %4252 = vmatprep.subr.bf16.mxu0 %v4669_v1 }
 0xbe0   : > { %v1711_v59 = vpop.xlane.xlu0 %1710 }
 0xbe1   : > { %4569 = vrcp.f32 %v1711_v59  ;;  %v4511_v59 = vld [vmem:[%s5504_s1 + $0xb0] sm:$0xff]  }
 0xbe2   : > { %v1714_v60 = vpop.xlane.xlu1 %1713 }
 0xbe3   : > { %4571 = vrcp.f32 %v1714_v60  ;;  %v4512_v60 = vld [vmem:[%s5504_s1 + $0xb8] sm:$0xff]  }
 0xbeb   : > { %v4570_v62 = vpop.eup %4569 }
 0xbed   : > { %v4572_v0 = vpop.eup %4571 }
 0xc29   : > { %v1754_v61 = vpop.f32.mrb[40].mxu0 }
 0xc2a   : > { %v4178_v63 = vpop.f32.mrb[41].mxu0  ;;  %v1763_v3 = vmul.f32 %v4570_v62, %v1754_v61 }
 0xc2b   : > { %v1757_v2 = vpop.f32.mrb[42].mxu0 }
 0xc2c   : > { %v1764_v4 = vmul.f32 %v4572_v0, %v1757_v2  ;;  %v4179_v5 = vpop.f32.mrb[43].mxu0 }
 0xc2e   : > { %v1765_v7 = vpack.c.bf16 %v1764_v4, %v1763_v3 }
 0xc30   : > { %4183 = vmatmul.mubr.msk.bf16.vlgmr.msra.gmra.mrb[48].mxu1 %vm479_vm2, %v1765_v7 }
 0xc31   : > { %4199 = vmatpush3.bf16.msra.mxu1 %v4493_v6  ;;  %4206 = vmatprep.mubr.msk.bf16.mxu1 %vm4670_vm0, %v4669_v1 }
 0xc32   : > { %4200 = vmatprep.subr.bf16.mxu1 %v4669_v1 }
 0xc35   : > { %4201 = vmatpush3.bf16.msra.mxu1 %v4494_v8  ;;  %v4505_v8 = vld [vmem:[%s5505_s2 + $0xa0] sm:$0xff]  }
 0xc36   : > { %4202 = vmatprep.subr.bf16.mxu1 %v4669_v1 }
 0xc39   : > { %4203 = vmatpush3.bf16.msra.mxu1 %v4496_v9  ;;  %v1884_v12 = vpop.f32.mrb[44].mxu0 }
 0xc3a   : > { %4204 = vmatprep.subr.bf16.mxu1 %v4669_v1  ;;  %v4196_v13 = vpop.f32.mrb[45].mxu0 }
 0xc3b   : > { %v1887_v14 = vpop.f32.mrb[46].mxu0  ;;  %v4510_v13 = vld [vmem:[%s5505_s2 + $0xb8] sm:$0xff]  }
 0xc3c   : > { %v2039_v15 = vpack.c.bf16 %v1887_v14, %v1884_v12  ;;  %v4197_v16 = vpop.f32.mrb[47].mxu0  ;;  %v4508_v12 = vld [vmem:[%s5505_s2 + $0xb0] sm:$0xff]  }
 0xc3d   : > { %4205 = vmatpush3.bf16.msra.mxu1 %v4498_v10  ;;  %v4506_v10 = vld [vmem:[%s5505_s2 + $0xa8] sm:$0xff]  }
 0xc3e   : > { %4222 = vmatprep.subr.bf16.mxu1 %v4669_v1 }
 0xc40   : > { %4207 = vmatmul.mubr.msk.bf16.vlgmr.msra.gmra.mrb[52].mxu1 %vm286_vm1, %v4797_v11 }
 0xc41   : > { %4224 = vmatprep.mubr.msk.bf16.mxu1 %vm4670_vm0, %v4669_v1 }
 0xc49   : > { %v2032_v39 = vpop.f32.mrb[48].mxu0 }
 0xc4a   : > { %v4220_v40 = vpop.f32.mrb[49].mxu0 }
 0xc4b   : > { %v2035_v41 = vpop.f32.mrb[50].mxu0 }
 0xc4c   : > { %v2107_v42 = vpack.c.bf16 %v2035_v41, %v2032_v39  ;;  %v4221_v43 = vpop.f32.mrb[51].mxu0 }
 0xd03   : > { %v1808_v24 = vpop.f32.mrb[48].mxu1 }
 0xd04   : > { %v5165_v26 = vadd.f32 %v1808_v24, %v5078_v21  ;;  %v4184_v27 = vpop.f32.mrb[49].mxu1  ;;  %v4515_v24 = vld [vmem:[%s5506_s3 + $0xb0] sm:$0xff]  }
 0xd05   : > { %v1811_v28 = vpop.f32.mrb[50].mxu1  ;;  %v4516_v27 = vld [vmem:[%s5506_s3 + $0xb8] sm:$0xff]  }
 0xd06   : > { %v5168_v29 = vadd.f32 %v1811_v28, %v5081_v25  ;;  %v4185_v30 = vpop.f32.mrb[51].mxu1 }
 0xd13   : > { %v1958_v31 = vpop.f32.mrb[52].mxu1 }
 0xd14   : > { %v4208_v32 = vpop.f32.mrb[53].mxu1 }
 0xd15   : > { %v1961_v19 = vpop.f32.mrb[54].mxu1 }
 0xd16   : > { %v2040_v33 = vpack.c.bf16 %v1961_v19, %v1958_v31  ;;  %v4209_v22 = vpop.f32.mrb[55].mxu1 }
 0xd18   : > { %v2045_v34 = vsel %vm479_vm2, %v2040_v33, 0 }
 0xd19   : > { %4223 = vmatpush3.bf16.xpose.msra.mxu1 %v2045_v34 }
 0xd1a   : > { %4228 = vmatprep.subr.bf16.mxu1 %v4669_v1 }
 0xd20   : > { %4225 = vmatmul.mubr.msk.bf16.vlgmr.msra.gmra.mrb[56].mxu1 %vm479_vm2, %v2039_v15 }
 0xd21   : > { %4230 = vmatprep.mubr.msk.bf16.mxu1 %vm4670_vm0, %v4669_v1  ;;  %4229 = vmatpush3.bf16.msra.mxu1 %v2107_v42 }
 0xd22   : > { %4240 = vmatprep.subr.bf16.mxu1 %v4669_v1 }
 0xdf3   : > { %v2081_v21 = vpop.f32.mrb[56].mxu1 }
 0xdf4   : > { %v4226_v35 = vpop.f32.mrb[57].mxu1  ;;  %v2088_v25 = vsel %vm527_vm3, %v2081_v21, -inf }
 0xdf5   : > { %2089 = vmax.xlane.f32.xlu0 %v2088_v25  ;;  %v2084_v36 = vpop.f32.mrb[58].mxu1 }
 0xdf6   : > { %v4227_v37 = vpop.f32.mrb[59].mxu1  ;;  %v2091_v38 = vsel %vm527_vm3, %v2084_v36, -inf }
 0xdf7   : > { %2092 = vmax.xlane.f32.xlu1 %v2091_v38 }
 0xe82   : > { %v2090_v44 = vpop.xlane.xlu0 %2089 }
 0xe83   : > { %v2094_v45 = vsub.f32 %v2081_v21, %v2090_v44 }
 0xe84   : > { %v2093_v46 = vpop.xlane.xlu1 %2092 }
 0xe85   : > { %v2096_v47 = vmul.f32 1.442695, %v2094_v45  ;;  %v2095_v48 = vsub.f32 %v2084_v36, %v2093_v46 }
 0xe87   : > { %4573 = vpow2.f32 %v2096_v47  ;;  %v2098_v49 = vmul.f32 1.442695, %v2095_v48 }
 0xe89   : > { %4575 = vpow2.f32 %v2098_v49 }
 0xe91   : > { %v4574_v50 = vpop.eup %4573 }
 0xe92   : > { %v2100_v51 = vsel %vm527_vm3, %v4574_v50, 0.0 }
 0xe93   : > { %v4576_v52 = vpop.eup %4575  ;;  %2101 = vadd.xlane.f32.xlu0 %v2100_v51 }
 0xe94   : > { %v2103_v53 = vsel %vm527_vm3, %v4576_v52, 0.0  ;;  %v2106_v54 = vpack.c.bf16 %v4576_v52, %v4574_v50 }
 0xe95   : > { %2104 = vadd.xlane.f32.xlu1 %v2103_v53 }
 0xe96   : > { %4231 = vmatmul.mubr.msk.bf16.vlgmr.msra.gmra.mrb[60].mxu1 %vm527_vm3, %v2106_v54 }
 0xe97   : > { %4248 = vmatprep.mubr.msk.bf16.mxu1 %vm4670_vm0, %v4669_v1  ;;  %4241 = vmatpush3.bf16.msra.mxu1 %v4507_v57  ;;  %v3706_v57 = vld [vmem:[%s5507_s4 + $0x14] sm:$0xf] }
 0xe98   : > { %4242 = vmatprep.subr.bf16.mxu1 %v4669_v1 }
 0xe9b   : > { %4243 = vmatpush3.bf16.msra.mxu1 %v4509_v58  ;;  %v2554_v58 = vsel %vm943_vm4, %v3706_v57, 0 }
 0xe9c   : > { %4244 = vmatprep.subr.bf16.mxu1 %v4669_v1 }
 0xe9f   : > { %4245 = vmatpush3.bf16.msra.mxu1 %v4511_v59  ;;  %v4519_v59 = vld [vmem:[%s5504_s1 + $0xc0] sm:$0xff]  }
 0xea0   : > { %4246 = vmatprep.subr.bf16.mxu1 %v4669_v1 }
 0xea3   : > { %4247 = vmatpush3.bf16.msra.mxu1 %v4512_v60  ;;  %v4521_v60 = vld [vmem:[%s5504_s1 + $0xc8] sm:$0xff]  }
 0xea4   : > { %4264 = vmatprep.subr.bf16.mxu1 %v4669_v1 }
 0xea6   : > { %4249 = vmatmul.mubr.msk.bf16.vlgmr.msra.gmra.mrb[64].mxu1 %vm286_vm1, %v4797_v11 }
 0xea7   : > { %4272 = vmatprep.mubr.msk.bf16.mxu1 %vm4670_vm0, %v4669_v1  ;;  %4265 = vmatpush3.bf16.msra.mxu1 %v4513_v20 }
 0xea8   : > { %4266 = vmatprep.subr.bf16.mxu1 %v4669_v1 }
 0xeab   : > { %4267 = vmatpush3.bf16.msra.mxu1 %v4514_v23 }
 0xeac   : > { %4268 = vmatprep.subr.bf16.mxu1 %v4669_v1 }
 0xeaf   : > { %4269 = vmatpush3.bf16.msra.mxu1 %v4515_v24  ;;  %v4525_v24 = vld [vmem:[%s5506_s3 + $0xc0] sm:$0xff]  }
 0xeb0   : > { %4270 = vmatprep.subr.bf16.mxu1 %v4669_v1 }
 0xeb3   : > { %4271 = vmatpush3.bf16.msra.mxu1 %v4516_v27  ;;  %v4526_v27 = vld [vmem:[%s5506_s3 + $0xc8] sm:$0xff]  }
 0xeb4   : > { %4288 = vmatprep.subr.bf16.mxu1 %v4669_v1 }
 0xeb6   : > { %4273 = vmatmul.mubr.msk.bf16.vlgmr.msra.gmra.mrb[68].mxu1 %vm286_vm1, %v4797_v11 }
 0xeb7   : > { %4290 = vmatprep.mubr.msk.bf16.mxu1 %vm4670_vm0, %v4669_v1  ;;  %4289 = vmatpush3.bf16.msra.mxu1 %v2554_v58 }
 0xeb8   : > { %4306 = vmatprep.subr.bf16.mxu1 %v4669_v1 }
 0xf20   : > { %v2102_v61 = vpop.xlane.xlu0 %2101 }
 0xf21   : > { %4577 = vrcp.f32 %v2102_v61  ;;  %v4523_v61 = vld [vmem:[%s5504_s1 + $0xd0] sm:$0xff]  }
 0xf22   : > { %v2105_v62 = vpop.xlane.xlu1 %2104 }
 0xf23   : > { %4579 = vrcp.f32 %v2105_v62  ;;  %v4524_v62 = vld [vmem:[%s5504_s1 + $0xd8] sm:$0xff]  }
 0xf2b   : > { %v4578_v0 = vpop.eup %4577 }
 0xf2d   : > { %v4580_v3 = vpop.eup %4579 }
 0xf69   : > { %v2145_v63 = vpop.f32.mrb[60].mxu1 }
 0xf6a   : > { %v4232_v2 = vpop.f32.mrb[61].mxu1  ;;  %v2154_v5 = vmul.f32 %v4578_v0, %v2145_v63 }
 0xf6b   : > { %v2148_v4 = vpop.f32.mrb[62].mxu1 }
 0xf6c   : > { %v2155_v6 = vmul.f32 %v4580_v3, %v2148_v4  ;;  %v4233_v7 = vpop.f32.mrb[63].mxu1 }
 0xf6e   : > { %v2156_v9 = vpack.c.bf16 %v2155_v6, %v2154_v5 }
 0xf70   : > { %4237 = vmatmul.mubr.msk.bf16.vlgmr.msra.gmra.mrb[52].mxu0 %vm479_vm2, %v2156_v9 }
 0xf71   : > { %4253 = vmatpush3.bf16.msra.mxu0 %v4505_v8  ;;  %4260 = vmatprep.mubr.msk.bf16.mxu0 %vm4670_vm0, %v4669_v1 }
 0xf72   : > { %4254 = vmatprep.subr.bf16.mxu0 %v4669_v1 }
 0xf75   : > { %4255 = vmatpush3.bf16.msra.mxu0 %v4506_v10  ;;  %v4517_v10 = vld [vmem:[%s5505_s2 + $0xc0] sm:$0xff]  }
 0xf76   : > { %4256 = vmatprep.subr.bf16.mxu0 %v4669_v1 }
 0xf79   : > { %4257 = vmatpush3.bf16.msra.mxu0 %v4508_v12  ;;  %v2275_v14 = vpop.f32.mrb[64].mxu1 }
 0xf7a   : > { %4258 = vmatprep.subr.bf16.mxu0 %v4669_v1  ;;  %v4250_v15 = vpop.f32.mrb[65].mxu1 }
 0xf7b   : > { %v2278_v16 = vpop.f32.mrb[66].mxu1  ;;  %v4522_v15 = vld [vmem:[%s5505_s2 + $0xd8] sm:$0xff]  }
 0xf7c   : > { %v2430_v17 = vpack.c.bf16 %v2278_v16, %v2275_v14  ;;  %v4251_v18 = vpop.f32.mrb[67].mxu1  ;;  %v4520_v14 = vld [vmem:[%s5505_s2 + $0xd0] sm:$0xff]  }
 0xf7d   : > { %4259 = vmatpush3.bf16.msra.mxu0 %v4510_v13  ;;  %v4518_v13 = vld [vmem:[%s5505_s2 + $0xc8] sm:$0xff]  }
 0xf7e   : > { %4276 = vmatprep.subr.bf16.mxu0 %v4669_v1 }
 0xf80   : > { %4261 = vmatmul.mubr.msk.bf16.vlgmr.msra.gmra.mrb[56].mxu0 %vm286_vm1, %v4797_v11 }
 0xf81   : > { %4278 = vmatprep.mubr.msk.bf16.mxu0 %vm4670_vm0, %v4669_v1 }
 0xf89   : > { %v2423_v41 = vpop.f32.mrb[68].mxu1 }
 0xf8a   : > { %v4274_v42 = vpop.f32.mrb[69].mxu1 }
 0xf8b   : > { %v2426_v43 = vpop.f32.mrb[70].mxu1 }
 0xf8c   : > { %v2498_v44 = vpack.c.bf16 %v2426_v43, %v2423_v41  ;;  %v4275_v45 = vpop.f32.mrb[71].mxu1 }
0x1043   : > { %v2199_v28 = vpop.f32.mrb[52].mxu0 }
0x1044   : > { %v5252_v30 = vadd.f32 %v2199_v28, %v5165_v26  ;;  %v4238_v31 = vpop.f32.mrb[53].mxu0  ;;  %v4527_v28 = vld [vmem:[%s5506_s3 + $0xd0] sm:$0xff]  }
0x1045   : > { %v2202_v32 = vpop.f32.mrb[54].mxu0  ;;  %v4528_v31 = vld [vmem:[%s5506_s3 + $0xd8] sm:$0xff]  }
0x1046   : > { %v5255_v19 = vadd.f32 %v2202_v32, %v5168_v29  ;;  %v4239_v33 = vpop.f32.mrb[55].mxu0 }
0x1053   : > { %v2349_v22 = vpop.f32.mrb[56].mxu0 }
0x1054   : > { %v4262_v34 = vpop.f32.mrb[57].mxu0 }
0x1055   : > { %v2352_v21 = vpop.f32.mrb[58].mxu0 }
0x1056   : > { %v2431_v35 = vpack.c.bf16 %v2352_v21, %v2349_v22  ;;  %v4263_v25 = vpop.f32.mrb[59].mxu0 }
0x1058   : > { %v2436_v36 = vsel %vm479_vm2, %v2431_v35, 0 }
0x1059   : > { %4277 = vmatpush3.bf16.xpose.msra.mxu0 %v2436_v36 }
0x105a   : > { %4282 = vmatprep.subr.bf16.mxu0 %v4669_v1 }
0x1060   : > { %4279 = vmatmul.mubr.msk.bf16.vlgmr.msra.gmra.mrb[60].mxu0 %vm479_vm2, %v2430_v17 }
0x1061   : > { %4284 = vmatprep.mubr.msk.bf16.mxu0 %vm4670_vm0, %v4669_v1  ;;  %4283 = vmatpush3.bf16.msra.mxu0 %v2498_v44 }
0x1062   : > { %4294 = vmatprep.subr.bf16.mxu0 %v4669_v1 }
0x1133   : > { %v2472_v26 = vpop.f32.mrb[60].mxu0 }
0x1134   : > { %v4280_v37 = vpop.f32.mrb[61].mxu0  ;;  %v2479_v29 = vsel %vm527_vm3, %v2472_v26, -inf }
0x1135   : > { %2480 = vmax.xlane.f32.xlu0 %v2479_v29  ;;  %v2475_v38 = vpop.f32.mrb[62].mxu0 }
0x1136   : > { %v4281_v39 = vpop.f32.mrb[63].mxu0  ;;  %v2482_v40 = vsel %vm527_vm3, %v2475_v38, -inf }
0x1137   : > { %2483 = vmax.xlane.f32.xlu1 %v2482_v40 }
0x11c2   : > { %v2481_v46 = vpop.xlane.xlu0 %2480 }
0x11c3   : > { %v2485_v47 = vsub.f32 %v2472_v26, %v2481_v46 }
0x11c4   : > { %v2484_v48 = vpop.xlane.xlu1 %2483 }
0x11c5   : > { %v2487_v49 = vmul.f32 1.442695, %v2485_v47  ;;  %v2486_v50 = vsub.f32 %v2475_v38, %v2484_v48 }
0x11c7   : > { %4581 = vpow2.f32 %v2487_v49  ;;  %v2489_v51 = vmul.f32 1.442695, %v2486_v50 }
0x11c9   : > { %4583 = vpow2.f32 %v2489_v51 }
0x11d1   : > { %v4582_v52 = vpop.eup %4581 }
0x11d2   : > { %v2491_v53 = vsel %vm527_vm3, %v4582_v52, 0.0 }
0x11d3   : > { %v4584_v54 = vpop.eup %4583  ;;  %2492 = vadd.xlane.f32.xlu0 %v2491_v53 }
0x11d4   : > { %v2494_v55 = vsel %vm527_vm3, %v4584_v54, 0.0  ;;  %v2497_v56 = vpack.c.bf16 %v4584_v54, %v4582_v52 }
0x11d5   : > { %2495 = vadd.xlane.f32.xlu1 %v2494_v55 }
0x11d6   : > { %4285 = vmatmul.mubr.msk.bf16.vlgmr.msra.gmra.mrb[64].mxu0 %vm527_vm3, %v2497_v56 }
0x11d7   : > { %4302 = vmatprep.mubr.msk.bf16.mxu0 %vm4670_vm0, %v4669_v1  ;;  %4295 = vmatpush3.bf16.msra.mxu0 %v4519_v59  ;;  %v3749_v59 = vld [vmem:[%s5507_s4 + $0x18] sm:$0xf] }
0x11d8   : > { %4296 = vmatprep.subr.bf16.mxu0 %v4669_v1 }
0x11db   : > { %4297 = vmatpush3.bf16.msra.mxu0 %v4521_v60  ;;  %v2945_v60 = vsel %vm943_vm4, %v3749_v59, 0  ;;  %v3792_v59 = vld [vmem:[%s5507_s4 + $0x1c] sm:$0xf] }
0x11dc   : > { %4298 = vmatprep.subr.bf16.mxu0 %v4669_v1 }
0x11df   : > { %4299 = vmatpush3.bf16.msra.mxu0 %v4523_v61  ;;  %v4531_v61 = vld [vmem:[%s5504_s1 + $0xe0] sm:$0xff]  }
0x11e0   : > { %4300 = vmatprep.subr.bf16.mxu0 %v4669_v1 }
0x11e3   : > { %4301 = vmatpush3.bf16.msra.mxu0 %v4524_v62  ;;  %v4533_v62 = vld [vmem:[%s5504_s1 + $0xe8] sm:$0xff]  }
0x11e4   : > { %4318 = vmatprep.subr.bf16.mxu0 %v4669_v1 }
0x11e6   : > { %4303 = vmatmul.mubr.msk.bf16.vlgmr.msra.gmra.mrb[68].mxu0 %vm286_vm1, %v4797_v11 }
0x11e7   : > { %4326 = vmatprep.mubr.msk.bf16.mxu0 %vm4670_vm0, %v4669_v1  ;;  %4319 = vmatpush3.bf16.msra.mxu0 %v4525_v24 }
0x11e8   : > { %4320 = vmatprep.subr.bf16.mxu0 %v4669_v1 }
0x11eb   : > { %4321 = vmatpush3.bf16.msra.mxu0 %v4526_v27 }
0x11ec   : > { %4322 = vmatprep.subr.bf16.mxu0 %v4669_v1 }
0x11ef   : > { %4323 = vmatpush3.bf16.msra.mxu0 %v4527_v28  ;;  %v4537_v28 = vld [vmem:[%s5506_s3 + $0xe0] sm:$0xff]  }
0x11f0   : > { %4324 = vmatprep.subr.bf16.mxu0 %v4669_v1 }
0x11f3   : > { %4325 = vmatpush3.bf16.msra.mxu0 %v4528_v31  ;;  %v4538_v31 = vld [vmem:[%s5506_s3 + $0xe8] sm:$0xff]  }
0x11f4   : > { %4342 = vmatprep.subr.bf16.mxu0 %v4669_v1 }
0x11f6   : > { %4327 = vmatmul.mubr.msk.bf16.vlgmr.msra.gmra.mrb[72].mxu0 %vm286_vm1, %v4797_v11 }
0x11f7   : > { %4344 = vmatprep.mubr.msk.bf16.mxu0 %vm4670_vm0, %v4669_v1  ;;  %4343 = vmatpush3.bf16.msra.mxu0 %v2945_v60  ;;  %v3336_v60 = vsel %vm943_vm4, %v3792_v59, 0 }
0x11f8   : > { %4360 = vmatprep.subr.bf16.mxu0 %v4669_v1 }
0x1260   : > { %v2493_v63 = vpop.xlane.xlu0 %2492 }
0x1261   : > { %4585 = vrcp.f32 %v2493_v63  ;;  %v4535_v63 = vld [vmem:[%s5504_s1 + $0xf0] sm:$0xff]  }
0x1262   : > { %v2496_v0 = vpop.xlane.xlu1 %2495 }
0x1263   : > { %4587 = vrcp.f32 %v2496_v0  ;;  %v4536_v0 = vld [vmem:[%s5504_s1 + $0xf8] sm:$0xff]  }
0x126b   : > { %v4586_v3 = vpop.eup %4585 }
0x126d   : > { %v4588_v5 = vpop.eup %4587 }
0x12a9   : > { %v2536_v2 = vpop.f32.mrb[64].mxu0 }
0x12aa   : > { %v4286_v4 = vpop.f32.mrb[65].mxu0  ;;  %v2545_v7 = vmul.f32 %v4586_v3, %v2536_v2 }
0x12ab   : > { %v2539_v6 = vpop.f32.mrb[66].mxu0 }
0x12ac   : > { %v2546_v8 = vmul.f32 %v4588_v5, %v2539_v6  ;;  %v4287_v9 = vpop.f32.mrb[67].mxu0 }
0x12ae   : > { %v2547_v12 = vpack.c.bf16 %v2546_v8, %v2545_v7 }
0x12b0   : > { %4291 = vmatmul.mubr.msk.bf16.vlgmr.msra.gmra.mrb[72].mxu1 %vm479_vm2, %v2547_v12 }
0x12b1   : > { %4307 = vmatpush3.bf16.msra.mxu1 %v4517_v10  ;;  %4314 = vmatprep.mubr.msk.bf16.mxu1 %vm4670_vm0, %v4669_v1 }
0x12b2   : > { %4308 = vmatprep.subr.bf16.mxu1 %v4669_v1 }
0x12b5   : > { %4309 = vmatpush3.bf16.msra.mxu1 %v4518_v13  ;;  %v4529_v13 = vld [vmem:[%s5505_s2 + $0xe0] sm:$0xff]  }
0x12b6   : > { %4310 = vmatprep.subr.bf16.mxu1 %v4669_v1 }
0x12b9   : > { %4311 = vmatpush3.bf16.msra.mxu1 %v4520_v14  ;;  %v2666_v16 = vpop.f32.mrb[68].mxu0 }
0x12ba   : > { %4312 = vmatprep.subr.bf16.mxu1 %v4669_v1  ;;  %v4304_v17 = vpop.f32.mrb[69].mxu0 }
0x12bb   : > { %v2669_v18 = vpop.f32.mrb[70].mxu0  ;;  %v4534_v17 = vld [vmem:[%s5505_s2 + $0xf8] sm:$0xff]  }
0x12bc   : > { %v2821_v20 = vpack.c.bf16 %v2669_v18, %v2666_v16  ;;  %v4305_v23 = vpop.f32.mrb[71].mxu0  ;;  %v4532_v16 = vld [vmem:[%s5505_s2 + $0xf0] sm:$0xff]  }
0x12bd   : > { %4313 = vmatpush3.bf16.msra.mxu1 %v4522_v15  ;;  %v4530_v15 = vld [vmem:[%s5505_s2 + $0xe8] sm:$0xff]  }
0x12be   : > { %4330 = vmatprep.subr.bf16.mxu1 %v4669_v1 }
0x12c0   : > { %4315 = vmatmul.mubr.msk.bf16.vlgmr.msra.gmra.mrb[76].mxu1 %vm286_vm1, %v4797_v11 }
0x12c1   : > { %4332 = vmatprep.mubr.msk.bf16.mxu1 %vm4670_vm0, %v4669_v1 }
0x12c9   : > { %v2814_v43 = vpop.f32.mrb[72].mxu0 }
0x12ca   : > { %v4328_v44 = vpop.f32.mrb[73].mxu0 }
0x12cb   : > { %v2817_v45 = vpop.f32.mrb[74].mxu0 }
0x12cc   : > { %v2889_v46 = vpack.c.bf16 %v2817_v45, %v2814_v43  ;;  %v4329_v47 = vpop.f32.mrb[75].mxu0 }
0x1383   : > { %v2590_v32 = vpop.f32.mrb[72].mxu1 }
0x1384   : > { %v5339_v33 = vadd.f32 %v2590_v32, %v5252_v30  ;;  %v4292_v22 = vpop.f32.mrb[73].mxu1  ;;  %v4539_v32 = vld [vmem:[%s5506_s3 + $0xf0] sm:$0xff]  }
0x1385   : > { %v2593_v34 = vpop.f32.mrb[74].mxu1  ;;  %v4540_v22 = vld [vmem:[%s5506_s3 + $0xf8] sm:$0xff]  }
0x1386   : > { %v5342_v21 = vadd.f32 %v2593_v34, %v5255_v19  ;;  %v4293_v35 = vpop.f32.mrb[75].mxu1 }
0x1393   : > { %v2740_v25 = vpop.f32.mrb[76].mxu1 }
0x1394   : > { %v4316_v36 = vpop.f32.mrb[77].mxu1 }
0x1395   : > { %v2743_v26 = vpop.f32.mrb[78].mxu1 }
0x1396   : > { %v2822_v37 = vpack.c.bf16 %v2743_v26, %v2740_v25  ;;  %v4317_v29 = vpop.f32.mrb[79].mxu1 }
0x1398   : > { %v2827_v38 = vsel %vm479_vm2, %v2822_v37, 0 }
0x1399   : > { %4331 = vmatpush3.bf16.xpose.msra.mxu1 %v2827_v38 }
0x139a   : > { %4336 = vmatprep.subr.bf16.mxu1 %v4669_v1 }
0x13a0   : > { %4333 = vmatmul.mubr.msk.bf16.vlgmr.msra.gmra.mrb[80].mxu1 %vm479_vm2, %v2821_v20 }
0x13a1   : > { %4338 = vmatprep.mubr.msk.bf16.mxu1 %vm4670_vm0, %v4669_v1  ;;  %4337 = vmatpush3.bf16.msra.mxu1 %v2889_v46 }
0x13a2   : > { %4348 = vmatprep.subr.bf16.mxu1 %v4669_v1 }
0x1473   : > { %v2863_v30 = vpop.f32.mrb[80].mxu1 }
0x1474   : > { %v4334_v39 = vpop.f32.mrb[81].mxu1  ;;  %v2870_v19 = vsel %vm527_vm3, %v2863_v30, -inf }
0x1475   : > { %2871 = vmax.xlane.f32.xlu0 %v2870_v19  ;;  %v2866_v40 = vpop.f32.mrb[82].mxu1 }
0x1476   : > { %v4335_v41 = vpop.f32.mrb[83].mxu1  ;;  %v2873_v42 = vsel %vm527_vm3, %v2866_v40, -inf }
0x1477   : > { %2874 = vmax.xlane.f32.xlu1 %v2873_v42 }
0x1502   : > { %v2872_v48 = vpop.xlane.xlu0 %2871 }
0x1503   : > { %v2876_v49 = vsub.f32 %v2863_v30, %v2872_v48 }
0x1504   : > { %v2875_v50 = vpop.xlane.xlu1 %2874 }
0x1505   : > { %v2878_v51 = vmul.f32 1.442695, %v2876_v49  ;;  %v2877_v52 = vsub.f32 %v2866_v40, %v2875_v50 }
0x1507   : > { %4589 = vpow2.f32 %v2878_v51  ;;  %v2880_v53 = vmul.f32 1.442695, %v2877_v52 }
0x1509   : > { %4591 = vpow2.f32 %v2880_v53 }
0x1511   : > { %v4590_v54 = vpop.eup %4589 }
0x1512   : > { %v2882_v55 = vsel %vm527_vm3, %v4590_v54, 0.0 }
0x1513   : > { %v4592_v56 = vpop.eup %4591  ;;  %2883 = vadd.xlane.f32.xlu0 %v2882_v55 }
0x1514   : > { %v2885_v57 = vsel %vm527_vm3, %v4592_v56, 0.0  ;;  %v2888_v58 = vpack.c.bf16 %v4592_v56, %v4590_v54 }
0x1515   : > { %2886 = vadd.xlane.f32.xlu1 %v2885_v57 }
0x1516   : > { %4339 = vmatmul.mubr.msk.bf16.vlgmr.msra.gmra.mrb[84].mxu1 %vm527_vm3, %v2888_v58 }
0x1517   : > { %4356 = vmatprep.mubr.msk.bf16.mxu1 %vm4670_vm0, %v4669_v1  ;;  %4349 = vmatpush3.bf16.msra.mxu1 %v4531_v61 }
0x1518   : > { %4350 = vmatprep.subr.bf16.mxu1 %v4669_v1 }
0x151b   : > { %4351 = vmatpush3.bf16.msra.mxu1 %v4533_v62 }
0x151c   : > { %4352 = vmatprep.subr.bf16.mxu1 %v4669_v1 }
0x151f   : > { %4353 = vmatpush3.bf16.msra.mxu1 %v4535_v63 }
0x1520   : > { %4354 = vmatprep.subr.bf16.mxu1 %v4669_v1 }
0x1523   : > { %4355 = vmatpush3.bf16.msra.mxu1 %v4536_v0 }
0x1524   : > { %4372 = vmatprep.subr.bf16.mxu1 %v4669_v1 }
0x1526   : > { %4357 = vmatmul.mubr.msk.bf16.vlgmr.msra.gmra.mrb[88].mxu1 %vm286_vm1, %v4797_v11 }
0x1527   : > { %4380 = vmatprep.mubr.msk.bf16.mxu1 %vm4670_vm0, %v4669_v1  ;;  %4373 = vmatpush3.bf16.msra.mxu1 %v4537_v28 }
0x1528   : > { %4374 = vmatprep.subr.bf16.mxu1 %v4669_v1 }
0x152b   : > { %4375 = vmatpush3.bf16.msra.mxu1 %v4538_v31 }
0x152c   : > { %4376 = vmatprep.subr.bf16.mxu1 %v4669_v1 }
0x152f   : > { %4377 = vmatpush3.bf16.msra.mxu1 %v4539_v32 }
0x1530   : > { %4378 = vmatprep.subr.bf16.mxu1 %v4669_v1 }
0x1533   : > { %4379 = vmatpush3.bf16.msra.mxu1 %v4540_v22 }
0x1534   : > { %4396 = vmatprep.subr.bf16.mxu1 %v4669_v1 }
0x1536   : > { %4381 = vmatmul.mubr.msk.bf16.vlgmr.msra.gmra.mrb[92].mxu1 %vm286_vm1, %v4797_v11 }
0x1537   : > { %4398 = vmatprep.mubr.msk.bf16.mxu1 %vm4670_vm0, %v4669_v1  ;;  %4397 = vmatpush3.bf16.msra.mxu1 %v3336_v60 }
0x15a0   : > { %v2884_v2 = vpop.xlane.xlu0 %2883 }
0x15a1   : > { %4593 = vrcp.f32 %v2884_v2 }
0x15a2   : > { %v2887_v3 = vpop.xlane.xlu1 %2886 }
0x15a3   : > { %4595 = vrcp.f32 %v2887_v3 }
0x15ab   : > { %v4594_v5 = vpop.eup %4593 }
0x15ad   : > { %v4596_v7 = vpop.eup %4595 }
0x15e9   : > { %v2927_v4 = vpop.f32.mrb[84].mxu1 }
0x15ea   : > { %v4340_v6 = vpop.f32.mrb[85].mxu1  ;;  %v2936_v9 = vmul.f32 %v4594_v5, %v2927_v4 }
0x15eb   : > { %v2930_v8 = vpop.f32.mrb[86].mxu1 }
0x15ec   : > { %v2937_v10 = vmul.f32 %v4596_v7, %v2930_v8  ;;  %v4341_v12 = vpop.f32.mrb[87].mxu1 }
0x15ee   : > { %v2938_v14 = vpack.c.bf16 %v2937_v10, %v2936_v9  ;;  %v3794_v10 = vld [vmem:[%s5508_s5] ss:$0 sm:$0xff] }
0x15f0   : > { %4345 = vmatmul.mubr.msk.bf16.vlgmr.msra.gmra.mrb[76].mxu0 %vm479_vm2, %v2938_v14 }
0x15f1   : > { %4361 = vmatpush3.bf16.msra.mxu0 %v4529_v13  ;;  %4368 = vmatprep.mubr.msk.bf16.mxu0 %vm4670_vm0, %v4669_v1 }
0x15f2   : > { %4362 = vmatprep.subr.bf16.mxu0 %v4669_v1 }
0x15f5   : > { %4363 = vmatpush3.bf16.msra.mxu0 %v4530_v15 }
0x15f6   : > { %4364 = vmatprep.subr.bf16.mxu0 %v4669_v1 }
0x15f9   : > { %4365 = vmatpush3.bf16.msra.mxu0 %v4532_v16  ;;  %v3057_v18 = vpop.f32.mrb[88].mxu1 }
0x15fa   : > { %4366 = vmatprep.subr.bf16.mxu0 %v4669_v1  ;;  %v4358_v20 = vpop.f32.mrb[89].mxu1 }
0x15fb   : > { %v3060_v23 = vpop.f32.mrb[90].mxu1 }
0x15fc   : > { %v3212_v24 = vpack.c.bf16 %v3060_v23, %v3057_v18  ;;  %v4359_v27 = vpop.f32.mrb[91].mxu1 }
0x15fd   : > { %4367 = vmatpush3.bf16.msra.mxu0 %v4534_v17 }
0x15fe   : > { %4384 = vmatprep.subr.bf16.mxu0 %v4669_v1 }
0x1600   : > { %4369 = vmatmul.mubr.msk.bf16.vlgmr.msra.gmra.mrb[80].mxu0 %vm286_vm1, %v4797_v11 }
0x1601   : > { %4386 = vmatprep.mubr.msk.bf16.mxu0 %vm4670_vm0, %v4669_v1 }
0x1609   : > { %v3205_v44 = vpop.f32.mrb[92].mxu1 }
0x160a   : > { %v4382_v45 = vpop.f32.mrb[93].mxu1 }
0x160b   : > { %v3208_v46 = vpop.f32.mrb[94].mxu1 }
0x160c   : > { %v3280_v47 = vpack.c.bf16 %v3208_v46, %v3205_v44  ;;  %v4383_v48 = vpop.f32.mrb[95].mxu1 }
0x16c3   : > { %v2981_v34 = vpop.f32.mrb[76].mxu0 }
0x16c4   : > { %v5426_v35 = vadd.f32 %v2981_v34, %v5339_v33  ;;  %v4346_v25 = vpop.f32.mrb[77].mxu0 }
0x16c5   : > { %v2984_v36 = vpop.f32.mrb[78].mxu0 }
0x16c6   : > { %v5429_v26 = vadd.f32 %v2984_v36, %v5342_v21  ;;  %v4347_v37 = vpop.f32.mrb[79].mxu0 }
0x16d3   : > { %v3131_v29 = vpop.f32.mrb[80].mxu0 }
0x16d4   : > { %v4370_v38 = vpop.f32.mrb[81].mxu0 }
0x16d5   : > { %v3134_v30 = vpop.f32.mrb[82].mxu0 }
0x16d6   : > { %v3213_v39 = vpack.c.bf16 %v3134_v30, %v3131_v29  ;;  %v4371_v19 = vpop.f32.mrb[83].mxu0 }
0x16d8   : > { %v3218_v11 = vsel %vm479_vm2, %v3213_v39, 0 }
0x16d9   : > { %4385 = vmatpush3.bf16.xpose.msra.mxu0 %v3218_v11 }
0x16da   : > { %4390 = vmatprep.subr.bf16.mxu0 %v4669_v1 }
0x16e0   : > { %4387 = vmatmul.mubr.msk.bf16.vlgmr.msra.gmra.mrb[84].mxu0 %vm479_vm2, %v3212_v24 }
0x16e1   : > { %4392 = vmatprep.mubr.msk.bf16.mxu0 %vm4670_vm0, %v4669_v1  ;;  %4391 = vmatpush3.bf16.msra.mxu0 %v3280_v47 }
0x17b3   : > { %v3254_v33 = vpop.f32.mrb[84].mxu0 }
0x17b4   : > { %v4388_v40 = vpop.f32.mrb[85].mxu0  ;;  %v3261_v21 = vsel %vm527_vm3, %v3254_v33, -inf }
0x17b5   : > { %3262 = vmax.xlane.f32.xlu0 %v3261_v21  ;;  %v3257_v41 = vpop.f32.mrb[86].mxu0 }
0x17b6   : > { %v4389_v42 = vpop.f32.mrb[87].mxu0  ;;  %v3264_v43 = vsel %vm527_vm3, %v3257_v41, -inf }
0x17b7   : > { %3265 = vmax.xlane.f32.xlu1 %v3264_v43 }
0x1842   : > { %v3263_v49 = vpop.xlane.xlu0 %3262 }
0x1843   : > { %v3267_v50 = vsub.f32 %v3254_v33, %v3263_v49 }
0x1844   : > { %v3266_v51 = vpop.xlane.xlu1 %3265 }
0x1845   : > { %v3269_v1 = vmul.f32 1.442695, %v3267_v50  ;;  %v3268_v52 = vsub.f32 %v3257_v41, %v3266_v51 }
0x1847   : > { %4597 = vpow2.f32 %v3269_v1  ;;  %v3271_v53 = vmul.f32 1.442695, %v3268_v52 }
0x1849   : > { %4599 = vpow2.f32 %v3271_v53 }
0x1851   : > { %v4598_v54 = vpop.eup %4597 }
0x1852   : > { %v3273_v55 = vsel %vm527_vm3, %v4598_v54, 0.0 }
0x1853   : > { %v4600_v56 = vpop.eup %4599  ;;  %3274 = vadd.xlane.f32.xlu0 %v3273_v55 }
0x1854   : > { %v3276_v57 = vsel %vm527_vm3, %v4600_v56, 0.0  ;;  %v3279_v58 = vpack.c.bf16 %v4600_v56, %v4598_v54 }
0x1855   : > { %3277 = vadd.xlane.f32.xlu1 %v3276_v57 }
0x1856   : > { %4393 = vmatmul.mubr.msk.bf16.vlgmr.msra.gmra.mrb[88].mxu0 %vm527_vm3, %v3279_v58 }
0x18e0   : > { %v3275_v61 = vpop.xlane.xlu0 %3274 }
0x18e1   : > { %4601 = vrcp.f32 %v3275_v61 }
0x18e2   : > { %v3278_v62 = vpop.xlane.xlu1 %3277 }
0x18e3   : > { %4603 = vrcp.f32 %v3278_v62 }
0x18eb   : > { %v4602_v0 = vpop.eup %4601 }
0x18ed   : > { %v4604_v3 = vpop.eup %4603 }
0x1929   : > { %v3318_v63 = vpop.f32.mrb[88].mxu0 }
0x192a   : > { %v4394_v2 = vpop.f32.mrb[89].mxu0  ;;  %v3327_v5 = vmul.f32 %v4602_v0, %v3318_v63 }
0x192b   : > { %v3321_v4 = vpop.f32.mrb[90].mxu0 }
0x192c   : > { %v3328_v6 = vmul.f32 %v4604_v3, %v3321_v4  ;;  %v4395_v7 = vpop.f32.mrb[91].mxu0 }
0x192e   : > { %v3329_v8 = vpack.c.bf16 %v3328_v6, %v3327_v5 }
0x1930   : > { %4399 = vmatmul.mubr.msk.bf16.vlgmr.msra.gmra.mrb[96].mxu1 %vm479_vm2, %v3329_v8 }
0x1a03   : > { %v3372_v9 = vpop.f32.mrb[96].mxu1 }
0x1a04   : > { %v3379_v12 = vadd.f32 %v3372_v9, %v5426_v35  ;;  %v4400_v13 = vpop.f32.mrb[97].mxu1 }
0x1a05   : > { %v3375_v14 = vpop.f32.mrb[98].mxu1 }
0x1a06   : > { %v3388_v15 = vadd.f32 %v3794_v10, %v3379_v12  ;;  %v3380_v16 = vadd.f32 %v3375_v14, %v5429_v26  ;;  %v4401_v17 = vpop.f32.mrb[99].mxu1 }
0x1a08   : > { %3390 = vst.msk [vmem:[%s244_s16] sm:$0xff] %vm286_vm1, %v3388_v15  ;;  %v3389_v18 = vadd.f32 %v3794_v10, %v3380_v16 }
0x1a0a   : > { %3391 = vst.msk [vmem:[%s244_s16 + $0x8] sm:$0xff] %vm286_vm1, %v3389_v18 }
0x1a0b   : > { %4618 = shalt.err (!%p4615_p3)
}
0x1a0c   : > { %s4619_s11 = scalar_lea.hbm %s5456_s26, 256  ;;  %s4623_s14 = scalar_lea.hbm %s5509_s6, 512 }
0x1a0d   : > { %p4620_p4 = scmp.ne.s32.totalorder %s5456_s26, %s4619_s11  ;;  %p4624_p9 = scmp.lt.u32.totalorder %s5456_s26, %s5509_s6 }
0x1a0e   : > { %p4625_p10 = scmp.lt.u32.totalorder %s4623_s14, %s4619_s11  ;;  %p4627_p12 = scmp.lt.u32.totalorder %s4619_s11, %s5456_s26 }
0x1a0f   : > { %p4621_p7 = pnand %p4620_p4, %p4747_p5 }
0x1a10   : > { %p4626_p11 = por %p4625_p10, %p4624_p9 }
0x1a11   : > { %p4622_p8 = pneg %p4621_p7 }
0x1a12   : > { %p4628_p13 = por %p4627_p12, %p4626_p11 }
0x1a14   : > { %p4629_p0 = pnand %p4628_p13, %p4622_p8 }
0x1a16   : > { %4632 = shalt.err (!%p4629_p0)
}
0x1a17   : > { %s4672_s18 = smov 128   ;;  %s4673_s19 = smov 8  }
0x1a18   : > { %4402 = dma.vmem_to_hbm [thread:$0]  (%p4747_p5), %s5458_s17, 256, %s5456_s26, %s5462_s25, %s4672_s18, %s4672_s18, %s4673_s19  }
0x1a19 PF: > { %p4408_p1 = scmp.ge.s32.totalorder %s4667_s24, 2  ;;  %s3421_s20 = sand.u32 1, %s4655_s21  }
0x1a1a   : > { %s3422_s28 = scalar_lea.sflag [#allocation3], %s3421_s20 }
0x1a1b   : > { %p4405_p2 = pnand %p4408_p1, %p4751_p6 }
0x1a1d   : > { %4650 = dma.done.wait (!%p4405_p2), %s3422_s28, 256  }
0x1a1e   : > { %4652 = vsyncadd (!%p4405_p2), %s3422_s28, 4294967040  ;;  %p16_p3 = scmp.ge.s32.totalorder %s4734_s27, 4   ;;  %s5512_s21 = smov %s4659_s22 }
0x1a1f   : > { %s5513_s22 = smov %s4663_s23  ;;  %s5514_s23 = smov %s4745_s30 }
0x1a20   : > { %s5515_s24 = smov %s4734_s27  ;;  %18 = sbr.rel (!%p16_p3) target bundleno = 3 (0x3), region = 107 }
0x1a27   :  { %3427 = vsyncpa [#allocation3], 1 }
0x1a28   :  { %3429 = vsyncpa [#allocation3 + $0x1], 1 }

</bundles_post_ra>
